<compile_context>
chip_gen: v7x
topology: tpu7x:2x2x1
jax: 0.10.0
libtpu: 0.0.40
codegen_flags: <defaults>
</compile_context>

<pallas_src>
import jax
import jax.numpy as jnp
from jax.experimental import pallas as pl
from jax.experimental.pallas import tpu as pltpu

IN_FEATURES = 3 * 28 * 28   # 2352
HIDDEN = 100
OUT_FEATURES = 10

HIDDEN_P = 128              # hidden padded to a lane multiple
OUT_P = 128                 # output padded to a lane multiple


def _mlp_kernel(x_ref, w1_ref, b1_ref, w2_ref, b2_ref, w3_ref, b3_ref, o_ref):
    """One batch tile of the fused 3-layer MLP. All operands resident in VMEM."""
    # Layer 1: (TB, 2352) @ (2352, 128)  -- f32 accumulation on the MXU.
    h1 = jnp.dot(x_ref[...], w1_ref[...], preferred_element_type=jnp.float32)
    h1 = jnp.maximum(h1 + b1_ref[...], 0.0)          # bias/ReLU in f32 (v5e-friendly)

    # Layer 2: (TB, 128) @ (128, 128)
    h2 = jnp.dot(h1, w2_ref[...], preferred_element_type=jnp.float32)
    h2 = jnp.maximum(h2 + b2_ref[...], 0.0)

    # Layer 3: (TB, 128) @ (128, 128) -- padded output keeps the store lane-dense.
    o_ref[...] = (jnp.dot(h2, w3_ref[...], preferred_element_type=jnp.float32)
                  + b3_ref[...]).astype(o_ref.dtype)


def classifier_forward(x, padded_params, *, use_bf16=False, batch_tile=512):
    """x: (B, 2352). padded_params: lane-padded weights from pad_params()."""
    B, F = x.shape
    assert F == IN_FEATURES

    w1 = padded_params["w1"]
    b1 = padded_params["b1"]
    w2 = padded_params["w2"]
    b2 = padded_params["b2"]
    w3 = padded_params["w3"]
    b3 = padded_params["b3"]

    if use_bf16:
        # bf16 for the layer-1 operands: halves the dominant x HBM traffic and uses the
        # MXU's native bf16 path; accumulation / biases / ReLU stay f32.
        x = x.astype(jnp.bfloat16)
        w1 = w1.astype(jnp.bfloat16)

    # Batch tiling. Small batches use a single full-batch tile; large batches are
    # padded up to a multiple of the tile so the grid divides evenly.
    if B <= batch_tile:
        TB, Bp = B, B
    else:
        TB = batch_tile
        Bp = TB * pl.cdiv(B, TB)
        if Bp != B:
            x = jnp.pad(x, ((0, Bp - B), (0, 0)))

    grid = (Bp // TB,)

    # Size the scoped-VMEM request from the real block footprint (double-buffered x and
    # out, resident weights) plus headroom; never request all of v7x's 64 MiB.
    x_bytes = 2 * TB * IN_FEATURES * x.dtype.itemsize
    w_bytes = (w1.size * w1.dtype.itemsize
               + (w2.size + w3.size + b1.size + b2.size + b3.size) * 4)
    o_bytes = 2 * TB * OUT_P * 4
    vmem_limit = int(1.5 * (x_bytes + w_bytes + o_bytes)) + (8 << 20)
    vmem_limit = max(16 << 20, min(vmem_limit, 48 << 20))

    out = pl.pallas_call(
        _mlp_kernel,
        out_shape=jax.ShapeDtypeStruct((Bp, OUT_P), jnp.float32),
        grid_spec=pltpu.PrefetchScalarGridSpec(
            num_scalar_prefetch=0,
            grid=grid,
            in_specs=[
                pl.BlockSpec((TB, IN_FEATURES), lambda i: (i, 0)),      # x: tiled
                pl.BlockSpec((IN_FEATURES, HIDDEN_P), lambda i: (0, 0)),  # w1: resident
                pl.BlockSpec((1, HIDDEN_P), lambda i: (0, 0)),          # b1
                pl.BlockSpec((HIDDEN_P, HIDDEN_P), lambda i: (0, 0)),   # w2
                pl.BlockSpec((1, HIDDEN_P), lambda i: (0, 0)),          # b2
                pl.BlockSpec((HIDDEN_P, OUT_P), lambda i: (0, 0)),      # w3
                pl.BlockSpec((1, OUT_P), lambda i: (0, 0)),             # b3
            ],
            out_specs=pl.BlockSpec((TB, OUT_P), lambda i: (i, 0)),
        ),
        compiler_params=pltpu.CompilerParams(
            dimension_semantics=("parallel",),   # megacore sharding on v7x
            vmem_limit_bytes=vmem_limit,
        ),
    )(x, w1, b1, w2, b2, w3, b3)

    # Strip batch padding and the inert padded output lanes.
    return out[:B, :OUT_FEATURES]


def init_params(key):
    """PyTorch-style init: U(-1/sqrt(fan_in), 1/sqrt(fan_in)); logical (unpadded) shapes."""
    ks = jax.random.split(key, 6)

    def linear(kw, kb, fan_in, fan_out):
        bound = 1.0 / jnp.sqrt(jnp.float32(fan_in))
        w = jax.random.uniform(kw, (fan_in, fan_out), jnp.float32, -bound, bound)
        b = jax.random.uniform(kb, (1, fan_out), jnp.float32, -bound, bound)
        return w, b

    w1, b1 = linear(ks[0], ks[1], IN_FEATURES, HIDDEN)
    w2, b2 = linear(ks[2], ks[3], HIDDEN, HIDDEN)
    w3, b3 = linear(ks[4], ks[5], HIDDEN, OUT_FEATURES)
    return dict(w1=w1, b1=b1, w2=w2, b2=b2, w3=w3, b3=b3)


def pad_params(p):
    """Zero-pad hidden/output dims to 128 lanes (done once, offline of the hot path)."""
    def pad2(a, rows, cols):
        return jnp.pad(a, ((0, rows - a.shape[0]), (0, cols - a.shape[1])))

    return dict(
        w1=pad2(p["w1"], IN_FEATURES, HIDDEN_P),
        b1=pad2(p["b1"], 1, HIDDEN_P),
        w2=pad2(p["w2"], HIDDEN_P, HIDDEN_P),
        b2=pad2(p["b2"], 1, HIDDEN_P),
        w3=pad2(p["w3"], HIDDEN_P, OUT_P),
        b3=pad2(p["b3"], 1, OUT_P),
    )


def reference_forward(x, p):
    h1 = jnp.maximum(x @ p["w1"] + p["b1"], 0.0)
    h2 = jnp.maximum(h1 @ p["w2"] + p["b2"], 0.0)
    return h2 @ p["w3"] + p["b3"]


if __name__ == "__main__":
    key = jax.random.PRNGKey(0)
    k_x, k_p = jax.random.split(key)

    B = 2
    x = jax.random.normal(k_x, (B, IN_FEATURES), jnp.float32)
    params = init_params(k_p)          # logical params (reference)
    kparams = pad_params(params)       # lane-padded params (kernel)

    # f32 path: must match the pure-JAX reference tightly.
    out = jax.block_until_ready(classifier_forward(x, kparams))
    ref = reference_forward(x, params)
    assert out.shape == (B, OUT_FEATURES)
    assert jnp.allclose(out, ref, atol=1e-4, rtol=1e-4), "f32 mismatch vs reference"

    # Opt-in bf16 layer-1 path (halves x streaming HBM traffic for large B); tolerance
    # is relaxed against the fp32 reference.
    out_bf16 = jax.block_until_ready(classifier_forward(x, kparams, use_bf16=True))
    assert jnp.allclose(out_bf16, ref, atol=5e-2, rtol=5e-2), "bf16 mismatch vs reference"

    print("KERNEL_OK")
</pallas_src>

<mosaic_0001>
module attributes {stable_mosaic.version = 11 : i64} {
  func.func @_mlp_kernel(%arg0: i32, %arg1: memref<2x2352xf32, #tpu.memory_space<vmem>>, %arg2: memref<2352x128xf32, #tpu.memory_space<vmem>>, %arg3: memref<1x128xf32, #tpu.memory_space<vmem>>, %arg4: memref<128x128xf32, #tpu.memory_space<vmem>>, %arg5: memref<1x128xf32, #tpu.memory_space<vmem>>, %arg6: memref<128x128xf32, #tpu.memory_space<vmem>>, %arg7: memref<1x128xf32, #tpu.memory_space<vmem>>, %arg8: memref<2x128xf32, #tpu.memory_space<vmem>>) attributes {dimension_semantics = [#tpu.dimension_semantics<parallel>], iteration_bounds = array<i64: 1>, scalar_prefetch = 0 : i64, scratch_operands = 0 : i64, tpu.core_type = #tpu.core_type<tc>, window_params = [{transform_indices = @transform_0, window_bounds = array<i64: 2, 2352>}, {pipeline_mode = #tpu.pipeline_mode<synchronous>, transform_indices = @transform_1, window_bounds = array<i64: 2352, 128>}, {pipeline_mode = #tpu.pipeline_mode<synchronous>, transform_indices = @transform_2, window_bounds = array<i64: 1, 128>}, {pipeline_mode = #tpu.pipeline_mode<synchronous>, transform_indices = @transform_3, window_bounds = array<i64: 128, 128>}, {pipeline_mode = #tpu.pipeline_mode<synchronous>, transform_indices = @transform_4, window_bounds = array<i64: 1, 128>}, {pipeline_mode = #tpu.pipeline_mode<synchronous>, transform_indices = @transform_5, window_bounds = array<i64: 128, 128>}, {pipeline_mode = #tpu.pipeline_mode<synchronous>, transform_indices = @transform_6, window_bounds = array<i64: 1, 128>}, {transform_indices = @transform_7, window_bounds = array<i64: 2, 128>}]} {
    %c0 = arith.constant 0 : index
    %c0_0 = arith.constant 0 : index
    %0 = vector.load %arg1[%c0, %c0_0] : memref<2x2352xf32, #tpu.memory_space<vmem>>, vector<2x2352xf32>
    %c0_1 = arith.constant 0 : index
    %c0_2 = arith.constant 0 : index
    %1 = vector.load %arg2[%c0_1, %c0_2] : memref<2352x128xf32, #tpu.memory_space<vmem>>, vector<2352x128xf32>
    %cst = arith.constant dense<0.000000e+00> : vector<2x128xf32>
    %2 = tpu.matmul %0, %1, %cst {dimension_numbers = #tpu.dot_dimension_numbers<[1], [0], [0], [1], [0, 0, 1, 1], [], []>} : vector<2x2352xf32>, vector<2352x128xf32>, vector<2x128xf32> -> vector<2x128xf32>
    %c0_3 = arith.constant 0 : index
    %c0_4 = arith.constant 0 : index
    %3 = vector.load %arg3[%c0_3, %c0_4] : memref<1x128xf32, #tpu.memory_space<vmem>>, vector<1x128xf32>
    %4 = vector.broadcast %3 : vector<1x128xf32> to vector<2x128xf32>
    %5 = arith.addf %2, %4 : vector<2x128xf32>
    %cst_5 = arith.constant 0.000000e+00 : f32
    %6 = vector.broadcast %cst_5 : f32 to vector<2x128xf32>
    %7 = arith.maximumf %5, %6 : vector<2x128xf32>
    %c0_6 = arith.constant 0 : index
    %c0_7 = arith.constant 0 : index
    %8 = vector.load %arg4[%c0_6, %c0_7] : memref<128x128xf32, #tpu.memory_space<vmem>>, vector<128x128xf32>
    %cst_8 = arith.constant dense<0.000000e+00> : vector<2x128xf32>
    %9 = tpu.matmul %7, %8, %cst_8 {dimension_numbers = #tpu.dot_dimension_numbers<[1], [0], [0], [1], [0, 0, 1, 1], [], []>} : vector<2x128xf32>, vector<128x128xf32>, vector<2x128xf32> -> vector<2x128xf32>
    %c0_9 = arith.constant 0 : index
    %c0_10 = arith.constant 0 : index
    %10 = vector.load %arg5[%c0_9, %c0_10] : memref<1x128xf32, #tpu.memory_space<vmem>>, vector<1x128xf32>
    %11 = vector.broadcast %10 : vector<1x128xf32> to vector<2x128xf32>
    %12 = arith.addf %9, %11 : vector<2x128xf32>
    %cst_11 = arith.constant 0.000000e+00 : f32
    %13 = vector.broadcast %cst_11 : f32 to vector<2x128xf32>
    %14 = arith.maximumf %12, %13 : vector<2x128xf32>
    %c0_12 = arith.constant 0 : index
    %c0_13 = arith.constant 0 : index
    %15 = vector.load %arg6[%c0_12, %c0_13] : memref<128x128xf32, #tpu.memory_space<vmem>>, vector<128x128xf32>
    %cst_14 = arith.constant dense<0.000000e+00> : vector<2x128xf32>
    %16 = tpu.matmul %14, %15, %cst_14 {dimension_numbers = #tpu.dot_dimension_numbers<[1], [0], [0], [1], [0, 0, 1, 1], [], []>} : vector<2x128xf32>, vector<128x128xf32>, vector<2x128xf32> -> vector<2x128xf32>
    %c0_15 = arith.constant 0 : index
    %c0_16 = arith.constant 0 : index
    %17 = vector.load %arg7[%c0_15, %c0_16] : memref<1x128xf32, #tpu.memory_space<vmem>>, vector<1x128xf32>
    %18 = vector.broadcast %17 : vector<1x128xf32> to vector<2x128xf32>
    %19 = arith.addf %16, %18 : vector<2x128xf32>
    %c0_17 = arith.constant 0 : index
    %c0_18 = arith.constant 0 : index
    %20 = vector.load %arg8[%c0_17, %c0_18] : memref<2x128xf32, #tpu.memory_space<vmem>>, vector<2x128xf32>
    tpu.vector_store %arg8[%c0_17, %c0_18], %19 {strides = array<i32>} : memref<2x128xf32, #tpu.memory_space<vmem>>, vector<2x128xf32>,
    return
  }
  func.func @transform_0(%arg0: i32) -> (i32, i32) {
    %c0_i32 = arith.constant 0 : i32
    %c0_i32_0 = arith.constant 0 : i32
    return %arg0, %c0_i32 : i32, i32
  }
  func.func @transform_1(%arg0: i32) -> (i32, i32) {
    %c0_i32 = arith.constant 0 : i32
    %c0_i32_0 = arith.constant 0 : i32
    %c0_i32_1 = arith.constant 0 : i32
    return %c0_i32, %c0_i32_0 : i32, i32
  }
  func.func @transform_2(%arg0: i32) -> (i32, i32) {
    %c0_i32 = arith.constant 0 : i32
    %c0_i32_0 = arith.constant 0 : i32
    %c0_i32_1 = arith.constant 0 : i32
    return %c0_i32, %c0_i32_0 : i32, i32
  }
  func.func @transform_3(%arg0: i32) -> (i32, i32) {
    %c0_i32 = arith.constant 0 : i32
    %c0_i32_0 = arith.constant 0 : i32
    %c0_i32_1 = arith.constant 0 : i32
    return %c0_i32, %c0_i32_0 : i32, i32
  }
  func.func @transform_4(%arg0: i32) -> (i32, i32) {
    %c0_i32 = arith.constant 0 : i32
    %c0_i32_0 = arith.constant 0 : i32
    %c0_i32_1 = arith.constant 0 : i32
    return %c0_i32, %c0_i32_0 : i32, i32
  }
  func.func @transform_5(%arg0: i32) -> (i32, i32) {
    %c0_i32 = arith.constant 0 : i32
    %c0_i32_0 = arith.constant 0 : i32
    %c0_i32_1 = arith.constant 0 : i32
    return %c0_i32, %c0_i32_0 : i32, i32
  }
  func.func @transform_6(%arg0: i32) -> (i32, i32) {
    %c0_i32 = arith.constant 0 : i32
    %c0_i32_0 = arith.constant 0 : i32
    %c0_i32_1 = arith.constant 0 : i32
    return %c0_i32, %c0_i32_0 : i32, i32
  }
  func.func @transform_7(%arg0: i32) -> (i32, i32) {
    %c0_i32 = arith.constant 0 : i32
    %c0_i32_0 = arith.constant 0 : i32
    return %arg0, %c0_i32 : i32, i32
  }
}

</mosaic_0001>

<bundles_post_ra>
// kernel: tpu_custom_call.1
= control target key start
LH: loop header
LB: loop body
LE: loop exit
PB: predicated region body
PF: predicated region fallthrough
CT: control target
= control target key end

     0   :  { %12 = vsyncpa [#allocation3], 0  ;;  %s2665_s0 = inlined_call_operand.hbm [shape: f32[2,2352], index: 0, kind: input, shape index: {}]   ;;  %s2666_s1 = inlined_call_operand.hbm [shape: f32[2352,128], index: 1, kind: input, shape index: {}]   ;;  %s2667_s2 = inlined_call_operand.hbm [shape: f32[1,128], index: 2, kind: input, shape index: {}]   ;;  %s2668_s3 = inlined_call_operand.hbm [shape: f32[128,128], index: 3, kind: input, shape index: {}]   ;;  %s2669_s4 = inlined_call_operand.hbm [shape: f32[1,128], index: 4, kind: input, shape index: {}]   ;;  %s2670_s5 = inlined_call_operand.hbm [shape: f32[128,128], index: 5, kind: input, shape index: {}]   ;;  %s2671_s6 = inlined_call_operand.hbm [shape: f32[1,128], index: 6, kind: input, shape index: {}]   ;;  %s2672_s7 = inlined_call_operand.hbm [shape: f32[2,128], index: 7, kind: output, shape index: {}]  }
   0x1   :  { %13 = vsyncpa [#allocation6], 0 }
   0x2   :  { %14 = vsyncpa [#allocation9], 0 }
   0x3   :  { %15 = vsyncpa [#allocation12], 0 }
   0x4   :  { %16 = vsyncpa [#allocation4], 0  ;;  %s2432_s24 = smov [#allocation5]   ;;  %s2246_s28 = scalar_lea.hbm %s2666_s1, 37632 }
   0x5   :  { %s32_s25 = sshll.u32 %s2432_s24, 4  ;;  %p2247_p0 = scmp.ne.s32.totalorder %s2666_s1, %s2246_s28  ;;  %s33_s25 = int_to_ptr.vmem [resolvable:$true] %s32_s25 }
   0x6   :  { %p2250_p1 = scmp.lt.u32.totalorder %s2246_s28, %s2666_s1 }
   0x8   :  { %p2252_p2 = pnand %p2250_p1, %p2247_p0 }
   0xa   :  { %2255 = shalt.err (!%p2252_p2)
}
   0xb   :  { %s2256_s10 = scalar_lea.vmem %s33_s25, 37632  ;;  %p2261_p4 = scmp.lt.s32.totalorder %s33_s25, %s33_s25 }
   0xc   :  { %p2257_p3 = scmp.ne.s32.totalorder %s33_s25, %s2256_s10  ;;  %p2262_p5 = scmp.lt.s32.totalorder %s2256_s10, %s2256_s10 }
   0xe   :  { %p2263_p6 = por %p2262_p5, %p2261_p4 }
  0x10   :  { %p2264_p7 = pnand %p2263_p6, %p2257_p3 }
  0x12   :  { %2267 = shalt.err (!%p2264_p7)
}
  0x13   :  { %s2433_s11 = smov 128   ;;  %s2434_s12 = smov 8  }
  0x14   :  { %38 = dma.hbm_to_vmem [thread:$0]  %s2666_s1, 37632, %s33_s25, [#allocation6], %s2433_s11, %s2433_s11, %s2434_s12  }
  0x15   :  { %s2435_s15 = smov [#allocation8]   ;;  %s2436_s17 = smov [#allocation11]  }
  0x16   :  { %s54_s16 = sshll.u32 %s2435_s15, 4  ;;  %s76_s18 = sshll.u32 %s2436_s17, 4  ;;  %s55_s16 = int_to_ptr.vmem [resolvable:$true] %s54_s16  ;;  %s77_s18 = int_to_ptr.vmem [resolvable:$true] %s76_s18 }
  0x17   :  { %s2268_s21 = scalar_lea.hbm %s2668_s3, 2048 }
  0x18   :  { %p2269_p8 = scmp.ne.s32.totalorder %s2668_s3, %s2268_s21  ;;  %p2272_p9 = scmp.lt.u32.totalorder %s2268_s21, %s2668_s3 }
  0x1a   :  { %p2274_p10 = pnand %p2272_p9, %p2269_p8 }
  0x1c   :  { %2277 = shalt.err (!%p2274_p10)
}
  0x1d   :  { %s2278_s1 = scalar_lea.vmem %s55_s16, 2048  ;;  %p2283_p12 = scmp.lt.s32.totalorder %s55_s16, %s55_s16 }
  0x1e   :  { %p2279_p11 = scmp.ne.s32.totalorder %s55_s16, %s2278_s1  ;;  %p2284_p13 = scmp.lt.s32.totalorder %s2278_s1, %s2278_s1 }
  0x20   :  { %p2285_p0 = por %p2284_p13, %p2283_p12 }
  0x22   :  { %p2286_p1 = pnand %p2285_p0, %p2279_p11 }
  0x24   :  { %2289 = shalt.err (!%p2286_p1)
}
  0x25   :  { %60 = dma.hbm_to_vmem [thread:$0]  %s2668_s3, 2048, %s55_s16, [#allocation9], %s2433_s11, %s2433_s11, %s2434_s12  }
  0x26   :  { %s2290_s30 = scalar_lea.hbm %s2670_s5, 2048 }
  0x27   :  { %p2291_p2 = scmp.ne.s32.totalorder %s2670_s5, %s2290_s30  ;;  %p2294_p3 = scmp.lt.u32.totalorder %s2290_s30, %s2670_s5 }
  0x29   :  { %p2296_p4 = pnand %p2294_p3, %p2291_p2 }
  0x2b   :  { %2299 = shalt.err (!%p2296_p4)
}
  0x2c   :  { %s2300_s14 = scalar_lea.vmem %s77_s18, 2048  ;;  %p2305_p6 = scmp.lt.s32.totalorder %s77_s18, %s77_s18 }
  0x2d   :  { %p2301_p5 = scmp.ne.s32.totalorder %s77_s18, %s2300_s14  ;;  %p2306_p7 = scmp.lt.s32.totalorder %s2300_s14, %s2300_s14 }
  0x2f   :  { %p2307_p8 = por %p2306_p7, %p2305_p6 }
  0x31   :  { %p2308_p9 = pnand %p2307_p8, %p2301_p5 }
  0x33   :  { %2311 = shalt.err (!%p2308_p9)
}
  0x34   :  { %82 = dma.hbm_to_vmem [thread:$0]  %s2670_s5, 2048, %s77_s18, [#allocation12], %s2433_s11, %s2433_s11, %s2434_s12  }
  0x35   :  { %s2437_s16 = smov [#allocation2]   ;;  %s2438_s19 = smov [#allocation7]  }
  0x36   :  { %s23_s17 = sshll.u32 %s2437_s16, 4  ;;  %s45_s20 = sshll.u32 %s2438_s19, 4  ;;  %s24_s17 = int_to_ptr.vmem [resolvable:$true] %s23_s17  ;;  %s46_s20 = int_to_ptr.vmem [resolvable:$true] %s45_s20 }
  0x37   :  { %s2312_s23 = scalar_lea.hbm %s2665_s0, 608 }
  0x38   :  { %p2313_p10 = scmp.ne.s32.totalorder %s2665_s0, %s2312_s23  ;;  %p2316_p11 = scmp.lt.u32.totalorder %s2312_s23, %s2665_s0 }
  0x3a   :  { %p2318_p12 = pnand %p2316_p11, %p2313_p10 }
  0x3c   :  { %2321 = shalt.err (!%p2318_p12)
}
  0x3d   :  { %s2322_s5 = scalar_lea.vmem %s24_s17, 608  ;;  %p2327_p0 = scmp.lt.s32.totalorder %s24_s17, %s24_s17 }
  0x3e   :  { %p2323_p13 = scmp.ne.s32.totalorder %s24_s17, %s2322_s5  ;;  %p2328_p1 = scmp.lt.s32.totalorder %s2322_s5, %s2322_s5 }
  0x40   :  { %p2329_p2 = por %p2328_p1, %p2327_p0 }
  0x42   :  { %p2330_p3 = pnand %p2329_p2, %p2323_p13 }
  0x44   :  { %2333 = shalt.err (!%p2330_p3)
}
  0x45   :  { %26 = dma.hbm_to_vmem [thread:$0]  %s2665_s0, 608, %s24_s17, [#allocation3]  }
  0x46   :  { %s2334_s28 = scalar_lea.hbm %s2667_s2, 16 }
  0x47   :  { %p2335_p4 = scmp.ne.s32.totalorder %s2667_s2, %s2334_s28  ;;  %p2338_p5 = scmp.lt.u32.totalorder %s2334_s28, %s2667_s2 }
  0x49   :  { %p2340_p6 = pnand %p2338_p5, %p2335_p4 }
  0x4b   :  { %2343 = shalt.err (!%p2340_p6)
}
  0x4c   :  { %s2344_s10 = scalar_lea.vmem %s46_s20, 16  ;;  %s2348_s13 = scalar_lea.vmem %s46_s20, 32 }
  0x4d   :  { %p2345_p7 = scmp.ne.s32.totalorder %s46_s20, %s2344_s10  ;;  %p2349_p8 = scmp.lt.s32.totalorder %s46_s20, %s46_s20 }
  0x4e   :  { %p2350_p9 = scmp.lt.s32.totalorder %s2348_s13, %s2344_s10 }
  0x50   :  { %p2351_p10 = por %p2350_p9, %p2349_p8 }
  0x52   :  { %p2352_p11 = pnand %p2351_p10, %p2345_p7 }
  0x54   :  { %2355 = shalt.err (!%p2352_p11)
}
  0x55   :  { %48 = dma.hbm_to_vmem [thread:$0]  %s2667_s2, 16, %s46_s20, [#allocation6]  }
  0x56   :  { %s2439_s3 = smov [#allocation10]   ;;  %s2440_s16 = smov [#allocation13]  }
  0x57   :  { %s67_s15 = sshll.u32 %s2439_s3, 4  ;;  %s89_s17 = sshll.u32 %s2440_s16, 4  ;;  %s68_s15 = int_to_ptr.vmem [resolvable:$true] %s67_s15  ;;  %s90_s17 = int_to_ptr.vmem [resolvable:$true] %s89_s17 }
  0x58   :  { %s2356_s22 = scalar_lea.hbm %s2669_s4, 16 }
  0x59   :  { %p2357_p12 = scmp.ne.s32.totalorder %s2669_s4, %s2356_s22  ;;  %p2360_p13 = scmp.lt.u32.totalorder %s2356_s22, %s2669_s4 }
  0x5b   :  { %p2362_p0 = pnand %p2360_p13, %p2357_p12 }
  0x5d   :  { %2365 = shalt.err (!%p2362_p0)
}
  0x5e   :  { %s2366_s2 = scalar_lea.vmem %s68_s15, 16  ;;  %s2370_s20 = scalar_lea.vmem %s68_s15, 32 }
  0x5f   :  { %p2367_p1 = scmp.ne.s32.totalorder %s68_s15, %s2366_s2  ;;  %p2371_p2 = scmp.lt.s32.totalorder %s68_s15, %s68_s15 }
  0x60   :  { %p2372_p3 = scmp.lt.s32.totalorder %s2370_s20, %s2366_s2 }
  0x62   :  { %p2373_p4 = por %p2372_p3, %p2371_p2 }
  0x64   :  { %p2374_p5 = pnand %p2373_p4, %p2367_p1 }
  0x66   :  { %2377 = shalt.err (!%p2374_p5)
}
  0x67   :  { %70 = dma.hbm_to_vmem [thread:$0]  %s2669_s4, 16, %s68_s15, [#allocation9]  }
  0x68   :  { %s2378_s18 = scalar_lea.hbm %s2671_s6, 16 }
  0x69   :  { %p2379_p6 = scmp.ne.s32.totalorder %s2671_s6, %s2378_s18  ;;  %p2382_p7 = scmp.lt.u32.totalorder %s2378_s18, %s2671_s6 }
  0x6b   :  { %p2384_p8 = pnand %p2382_p7, %p2379_p6 }
  0x6d   :  { %2387 = shalt.err (!%p2384_p8)
}
  0x6e   :  { %s2388_s8 = scalar_lea.vmem %s90_s17, 16  ;;  %s2392_s9 = scalar_lea.vmem %s90_s17, 32 }
  0x6f   :  { %p2389_p9 = scmp.ne.s32.totalorder %s90_s17, %s2388_s8  ;;  %p2393_p10 = scmp.lt.s32.totalorder %s90_s17, %s90_s17 }
  0x70   :  { %p2394_p11 = scmp.lt.s32.totalorder %s2392_s9, %s2388_s8 }
  0x72   :  { %p2395_p12 = por %p2394_p11, %p2393_p10 }
  0x74   :  { %p2396_p13 = pnand %p2395_p12, %p2389_p9 }
  0x76   :  { %2399 = shalt.err (!%p2396_p13)
}
  0x77   :  { %92 = dma.hbm_to_vmem [thread:$0]  %s2671_s6, 16, %s90_s17, [#allocation12]  }
  0x78   :  { %2422 = dma.done.wait [#allocation3], 608  }
  0x79   :  { %2423 = vsyncadd [#allocation3], 4294966688 }
  0x7a   :  { %2424 = dma.done.wait [#allocation6], 37648  }
  0x7b   :  { %2425 = vsyncadd [#allocation6], 4294929648 }
  0x7c   :  { %2426 = dma.done.wait [#allocation9], 2064  }
  0x7d   :  { %2427 = vsyncadd [#allocation9], 4294965232 }
  0x7e   :  { %2428 = dma.done.wait [#allocation12], 2064  }
  0x7f   :  { %2429 = vsyncadd [#allocation12], 4294965232  ;;  %v135_v0 = vld [vmem:[#allocation5 + $0x80] sm:$0xff]  ;;  %v136_v1 = vld [vmem:[#allocation5 + $0x88] sm:$0xff]  ;;  %v2441_v43 = vmov 1983009808   ;;  %v429_v45 = vlaneseq }
  0x80   :  { %v119_v2 = vld [vmem:[#allocation5] sm:$0xff]  ;;  %v1882_v3 = vpack.c.bf16 %v136_v1, %v135_v0  ;;  %v120_v4 = vld [vmem:[#allocation5 + $0x8] sm:$0xff]  ;;  %v137_v11 = vld [vmem:[#allocation5 + $0x90] sm:$0xff]  ;;  %v427_v44 = vunpack.c.l.s4 %v2441_v43  ;;  %vm2443_vm0 = vmmov 0   ;;  %vm527_vm1 = vcmask 392192   ;;  %s2445_s6 = smov [#allocation14]  }
  0x81   :  { %v167_v5 = vld [vmem:[#allocation5 + $0x180] sm:$0xff]  ;;  %v168_v6 = vld [vmem:[#allocation5 + $0x188] sm:$0xff]  ;;  %v1884_v7 = vpack.c.bf16 %v120_v4, %v119_v2  ;;  %v138_v13 = vld [vmem:[#allocation5 + $0x98] sm:$0xff]  ;;  %v430_v60 = vshrl.u32 %v429_v45, 7  ;;  %s1425_s13 = sshll.u32 %s2445_s6, 4  ;;  %s1426_s13 = int_to_ptr.vmem [resolvable:$true] %s1425_s13 }
  0x82   :  { %v1914_v8 = vpack.c.bf16 %v168_v6, %v167_v5  ;;  %v151_v9 = vld [vmem:[#allocation5 + $0x100] sm:$0xff]  ;;  %v152_v10 = vld [vmem:[#allocation5 + $0x108] sm:$0xff]  ;;  %1883 = vmatprep.subr.bf16.mxu0 %v1882_v3  ;;  %v121_v14 = vld [vmem:[#allocation5 + $0x10] sm:$0xff]  ;;  %v1886_v16 = vpack.c.bf16 %v138_v13, %v137_v11  ;;  %v428_v59 = vunpack.c.0.s8 %v427_v44  ;;  %s2400_s0 = scalar_lea.vmem %s1426_s13, 32  ;;  %p2405_p1 = scmp.lt.s32.totalorder %s1426_s13, %s1426_s13 }
  0x83   :  { %v1916_v12 = vpack.c.bf16 %v152_v10, %v151_v9  ;;  %v122_v15 = vld [vmem:[#allocation5 + $0x18] sm:$0xff]  ;;  %1885 = vmatpush3.bf16.msra.mxu0 %v1884_v7  ;;  %v169_v18 = vld [vmem:[#allocation5 + $0x190] sm:$0xff]  ;;  %v139_v23 = vld [vmem:[#allocation5 + $0xa0] sm:$0xff]  ;;  %p2401_p0 = scmp.ne.s32.totalorder %s1426_s13, %s2400_s0  ;;  %p2406_p2 = scmp.lt.s32.totalorder %s2400_s0, %s2400_s0 }
  0x84   :  { %1915 = vmatprep.subr.bf16.mxu1 %v1914_v8  ;;  %v1888_v17 = vpack.c.bf16 %v122_v15, %v121_v14  ;;  %v170_v19 = vld [vmem:[#allocation5 + $0x198] sm:$0xff]  ;;  %v153_v20 = vld [vmem:[#allocation5 + $0x110] sm:$0xff]  ;;  %v140_v24 = vld [vmem:[#allocation5 + $0xa8] sm:$0xff]  ;;  %1887 = vmatprep.subr.bf16.mxu0 %v1886_v16  ;;  %v2579_v10 = vsub.s32 %v428_v59, %v430_v60 }
  0x85   :  { %1917 = vmatpush3.bf16.msra.mxu1 %v1916_v12  ;;  %v1918_v21 = vpack.c.bf16 %v170_v19, %v169_v18  ;;  %v154_v22 = vld [vmem:[#allocation5 + $0x118] sm:$0xff]  ;;  %v1890_v26 = vpack.c.bf16 %v140_v24, %v139_v23  ;;  %v123_v27 = vld [vmem:[#allocation5 + $0x20] sm:$0xff]  ;;  %v124_v28 = vld [vmem:[#allocation5 + $0x28] sm:$0xff]  ;;  %p2407_p3 = por %p2406_p2, %p2405_p1 }
  0x86   :  { %v1920_v25 = vpack.c.bf16 %v154_v22, %v153_v20  ;;  %v171_v29 = vld [vmem:[#allocation5 + $0x1a0] sm:$0xff]  ;;  %v172_v30 = vld [vmem:[#allocation5 + $0x1a8] sm:$0xff]  ;;  %v1892_v33 = vpack.c.bf16 %v124_v28, %v123_v27  ;;  %v141_v35 = vld [vmem:[#allocation5 + $0xb0] sm:$0xff] }
  0x87   :  { %1919 = vmatprep.subr.bf16.mxu1 %v1918_v21  ;;  %v155_v31 = vld [vmem:[#allocation5 + $0x120] sm:$0xff]  ;;  %v156_v32 = vld [vmem:[#allocation5 + $0x128] sm:$0xff]  ;;  %1889 = vmatpush3.bf16.msra.mxu0 %v1888_v17  ;;  %v1922_v34 = vpack.c.bf16 %v172_v30, %v171_v29  ;;  %v142_v36 = vld [vmem:[#allocation5 + $0xb8] sm:$0xff]  ;;  %p2408_p4 = pnand %p2407_p3, %p2401_p0 }
  0x88   :  { %v125_v37 = vld [vmem:[#allocation5 + $0x30] sm:$0xff]  ;;  %1891 = vmatprep.subr.bf16.mxu0 %v1890_v26  ;;  %v1924_v38 = vpack.c.bf16 %v156_v32, %v155_v31  ;;  %v1894_v39 = vpack.c.bf16 %v142_v36, %v141_v35  ;;  %v126_v40 = vld [vmem:[#allocation5 + $0x38] sm:$0xff]  ;;  %v143_v49 = vld [vmem:[#allocation5 + $0xc0] sm:$0xff] }
  0x89   :  { %1921 = vmatpush3.bf16.msra.mxu1 %v1920_v25  ;;  %v173_v41 = vld [vmem:[#allocation5 + $0x1b0] sm:$0xff]  ;;  %v174_v42 = vld [vmem:[#allocation5 + $0x1b8] sm:$0xff]  ;;  %v144_v50 = vld [vmem:[#allocation5 + $0xc8] sm:$0xff]  ;;  %v1896_v51 = vpack.c.bf16 %v126_v40, %v125_v37 }
  0x8a   :  { %1923 = vmatprep.subr.bf16.mxu1 %v1922_v34  ;;  %v1926_v46 = vpack.c.bf16 %v174_v42, %v173_v41  ;;  %v157_v47 = vld [vmem:[#allocation5 + $0x130] sm:$0xff]  ;;  %v158_v48 = vld [vmem:[#allocation5 + $0x138] sm:$0xff]  ;;  %v175_v52 = vld [vmem:[#allocation5 + $0x1c0] sm:$0xff]  ;;  %v1898_v55 = vpack.c.bf16 %v144_v50, %v143_v49 }
  0x8b   :  { %1893 = vmatpush3.bf16.msra.mxu0 %v1892_v33  ;;  %v176_v53 = vld [vmem:[#allocation5 + $0x1c8] sm:$0xff]  ;;  %v1928_v54 = vpack.c.bf16 %v158_v48, %v157_v47  ;;  %v127_v56 = vld [vmem:[#allocation5 + $0x40] sm:$0xff]  ;;  %v145_v63 = vld [vmem:[#allocation5 + $0xd0] sm:$0xff] }
  0x8c   :  { %1895 = vmatprep.subr.bf16.mxu0 %v1894_v39  ;;  %v128_v57 = vld [vmem:[#allocation5 + $0x48] sm:$0xff]  ;;  %v159_v58 = vld [vmem:[#allocation5 + $0x140] sm:$0xff]  ;;  %v1930_v61 = vpack.c.bf16 %v176_v53, %v175_v52  ;;  %v146_v0 = vld [vmem:[#allocation5 + $0xd8] sm:$0xff] }
  0x8d   :  { %1925 = vmatpush3.bf16.msra.mxu1 %v1924_v38  ;;  %v160_v62 = vld [vmem:[#allocation5 + $0x148] sm:$0xff]  ;;  %v177_v1 = vld [vmem:[#allocation5 + $0x1d0] sm:$0xff]  ;;  %v178_v2 = vld [vmem:[#allocation5 + $0x1d8] sm:$0xff]  ;;  %v1900_v3 = vpack.c.bf16 %v128_v57, %v127_v56  ;;  %v1902_v6 = vpack.c.bf16 %v146_v0, %v145_v63 }
  0x8e   :  { %1927 = vmatprep.subr.bf16.mxu1 %v1926_v46  ;;  %v129_v4 = vld [vmem:[#allocation5 + $0x50] sm:$0xff]  ;;  %v1932_v5 = vpack.c.bf16 %v160_v62, %v159_v58  ;;  %v130_v7 = vld [vmem:[#allocation5 + $0x58] sm:$0xff]  ;;  %v1934_v11 = vpack.c.bf16 %v178_v2, %v177_v1  ;;  %v147_v12 = vld [vmem:[#allocation5 + $0xe0] sm:$0xff] }
  0x8f   :  { %1897 = vmatpush3.bf16.msra.mxu0 %v1896_v51  ;;  %v161_v8 = vld [vmem:[#allocation5 + $0x150] sm:$0xff]  ;;  %v162_v9 = vld [vmem:[#allocation5 + $0x158] sm:$0xff]  ;;  %v148_v13 = vld [vmem:[#allocation5 + $0xe8] sm:$0xff]  ;;  %v1904_v16 = vpack.c.bf16 %v130_v7, %v129_v4 }
  0x90   :  { %1899 = vmatprep.subr.bf16.mxu0 %v1898_v55  ;;  %v179_v14 = vld [vmem:[#allocation5 + $0x1e0] sm:$0xff]  ;;  %v180_v15 = vld [vmem:[#allocation5 + $0x1e8] sm:$0xff]  ;;  %v1936_v17 = vpack.c.bf16 %v162_v9, %v161_v8  ;;  %v1906_v19 = vpack.c.bf16 %v148_v13, %v147_v12  ;;  %v149_v27 = vld [vmem:[#allocation5 + $0xf0] sm:$0xff] }
  0x91   :  { %1929 = vmatpush3.bf16.msra.mxu1 %v1928_v54  ;;  %v114_v18 = vld [vmem:[#allocation2] sm:$0xff]  ;;  %v132_v21 = vld [vmem:[#allocation5 + $0x68] sm:$0xff]  ;;  %v1938_v25 = vpack.c.bf16 %v180_v15, %v179_v14  ;;  %v181_v29 = vld [vmem:[#allocation5 + $0x1f0] sm:$0xff] }
  0x92   :  { %1931 = vmatprep.subr.bf16.mxu1 %v1930_v61  ;;  %v131_v20 = vld [vmem:[#allocation5 + $0x60] sm:$0xff]  ;;  %v432_v23 = vrot.slane %v114_v18, %v2579_v10  ;;  %v425_v24 = vcombine.high %v114_v18, %v114_v18  ;;  %v164_v26 = vld [vmem:[#allocation5 + $0x168] sm:$0xff]  ;;  %v150_v28 = vld [vmem:[#allocation5 + $0xf8] sm:$0xff] }
  0x93   :  { %1901 = vmatpush3.bf16.msra.mxu0 %v1900_v3  ;;  %v163_v22 = vld [vmem:[#allocation5 + $0x160] sm:$0xff]  ;;  %v182_v30 = vld [vmem:[#allocation5 + $0x1f8] sm:$0xff]  ;;  %v1908_v33 = vpack.c.bf16 %v132_v21, %v131_v20  ;;  %v1910_v35 = vpack.c.bf16 %v150_v28, %v149_v27  ;;  %v133_v36 = vld [vmem:[#allocation5 + $0x70] sm:$0xff] }
  0x94   :  { %1903 = vmatprep.subr.bf16.mxu0 %v1902_v6  ;;  %v440_v31 = vcombine.high %v432_v23, %v432_v23  ;;  %v439_v32 = vrot.slane %v425_v24, %v2579_v10  ;;  %v1940_v34 = vpack.c.bf16 %v164_v26, %v163_v22  ;;  %v134_v37 = vld [vmem:[#allocation5 + $0x78] sm:$0xff]  ;;  %v165_v38 = vld [vmem:[#allocation5 + $0x170] sm:$0xff]  ;;  %v1942_v40 = vpack.c.bf16 %v182_v30, %v181_v29  ;;  %v199_v42 = vld [vmem:[#allocation5 + $0x280] sm:$0xff] }
  0x95   :  { %1933 = vmatpush3.bf16.msra.mxu1 %v1932_v5  ;;  %v166_v41 = vld [vmem:[#allocation5 + $0x178] sm:$0xff]  ;;  %v200_v43 = vld [vmem:[#allocation5 + $0x288] sm:$0xff]  ;;  %v231_v44 = vld [vmem:[#allocation5 + $0x380] sm:$0xff]  ;;  %v1912_v46 = vpack.c.bf16 %v134_v37, %v133_v36 }
  0x96   :  { %1935 = vmatprep.subr.bf16.mxu1 %v1934_v11  ;;  %v441_v39 = vcombine.high %v439_v32, %v439_v32  ;;  %594 = vmatprep.mubr.f32.mxu0 %v440_v31  ;;  %v232_v45 = vld [vmem:[#allocation5 + $0x388] sm:$0xff]  ;;  %v1944_v47 = vpack.c.bf16 %v166_v41, %v165_v38  ;;  %v1946_v48 = vpack.c.bf16 %v200_v43, %v199_v42  ;;  %v183_v49 = vld [vmem:[#allocation5 + $0x200] sm:$0xff]  ;;  %v201_v54 = vld [vmem:[#allocation5 + $0x290] sm:$0xff] }
  0x97   :  { %1905 = vmatpush3.bf16.msra.mxu0 %v1904_v16  ;;  %v184_v50 = vld [vmem:[#allocation5 + $0x208] sm:$0xff]  ;;  %v215_v51 = vld [vmem:[#allocation5 + $0x300] sm:$0xff]  ;;  %v1978_v52 = vpack.c.bf16 %v232_v45, %v231_v44  ;;  %v202_v55 = vld [vmem:[#allocation5 + $0x298] sm:$0xff] }
  0x98   :  { %1907 = vmatprep.subr.bf16.mxu0 %v1906_v19  ;;  %664 = vmatprep.mubr.f32.mxu1 %v441_v39  ;;  %v216_v53 = vld [vmem:[#allocation5 + $0x308] sm:$0xff]  ;;  %v233_v56 = vld [vmem:[#allocation5 + $0x390] sm:$0xff]  ;;  %v234_v57 = vld [vmem:[#allocation5 + $0x398] sm:$0xff]  ;;  %v1948_v58 = vpack.c.bf16 %v184_v50, %v183_v49  ;;  %v1950_v60 = vpack.c.bf16 %v202_v55, %v201_v54 }
  0x99   :  { %1937 = vmatpush3.bf16.msra.mxu1 %v1936_v17  ;;  %v1980_v59 = vpack.c.bf16 %v216_v53, %v215_v51  ;;  %v185_v61 = vld [vmem:[#allocation5 + $0x210] sm:$0xff]  ;;  %v186_v62 = vld [vmem:[#allocation5 + $0x218] sm:$0xff]  ;;  %v1982_v0 = vpack.c.bf16 %v234_v57, %v233_v56  ;;  %v203_v2 = vld [vmem:[#allocation5 + $0x2a0] sm:$0xff] }
  0x9a   :  { %1939 = vmatprep.subr.bf16.mxu1 %v1938_v25  ;;  %v217_v63 = vld [vmem:[#allocation5 + $0x310] sm:$0xff]  ;;  %v218_v1 = vld [vmem:[#allocation5 + $0x318] sm:$0xff]  ;;  %v204_v3 = vld [vmem:[#allocation5 + $0x2a8] sm:$0xff]  ;;  %v1952_v6 = vpack.c.bf16 %v186_v62, %v185_v61 }
  0x9b   :  { %1909 = vmatpush3.bf16.msra.mxu0 %v1908_v33  ;;  %v235_v4 = vld [vmem:[#allocation5 + $0x3a0] sm:$0xff]  ;;  %v236_v5 = vld [vmem:[#allocation5 + $0x3a8] sm:$0xff]  ;;  %v1984_v7 = vpack.c.bf16 %v218_v1, %v217_v63  ;;  %v1954_v8 = vpack.c.bf16 %v204_v3, %v203_v2  ;;  %v205_v15 = vld [vmem:[#allocation5 + $0x2b0] sm:$0xff] }
  0x9c   :  { %1911 = vmatprep.subr.bf16.mxu0 %v1910_v35  ;;  %v187_v9 = vld [vmem:[#allocation5 + $0x220] sm:$0xff]  ;;  %v188_v11 = vld [vmem:[#allocation5 + $0x228] sm:$0xff]  ;;  %v1986_v13 = vpack.c.bf16 %v236_v5, %v235_v4  ;;  %v206_v16 = vld [vmem:[#allocation5 + $0x2b8] sm:$0xff] }
  0x9d   :  { %1941 = vmatpush3.bf16.msra.mxu1 %v1940_v34  ;;  %v219_v12 = vld [vmem:[#allocation5 + $0x320] sm:$0xff]  ;;  %v220_v14 = vld [vmem:[#allocation5 + $0x328] sm:$0xff]  ;;  %v237_v17 = vld [vmem:[#allocation5 + $0x3b0] sm:$0xff]  ;;  %v1956_v19 = vpack.c.bf16 %v188_v11, %v187_v9  ;;  %v1958_v22 = vpack.c.bf16 %v206_v16, %v205_v15 }
  0x9e   :  { %1943 = vmatprep.subr.bf16.mxu1 %v1942_v40  ;;  %v238_v18 = vld [vmem:[#allocation5 + $0x3b8] sm:$0xff]  ;;  %v189_v20 = vld [vmem:[#allocation5 + $0x230] sm:$0xff]  ;;  %v1988_v21 = vpack.c.bf16 %v220_v14, %v219_v12  ;;  %v207_v27 = vld [vmem:[#allocation5 + $0x2c0] sm:$0xff] }
  0x9f   :  { %1913 = vmatpush3.bf16.msra.mxu0 %v1912_v46  ;;  %v221_v24 = vld [vmem:[#allocation5 + $0x330] sm:$0xff]  ;;  %v222_v25 = vld [vmem:[#allocation5 + $0x338] sm:$0xff]  ;;  %v1990_v26 = vpack.c.bf16 %v238_v18, %v237_v17  ;;  %v208_v28 = vld [vmem:[#allocation5 + $0x2c8] sm:$0xff] }
  0xa0   :  { %1947 = vmatprep.subr.bf16.mxu0 %v1946_v48  ;;  %v115_v29 = vld [vmem:[#allocation2 + $0x8] sm:$0xff]  ;;  %v1992_v35 = vpack.c.bf16 %v222_v25, %v221_v24  ;;  %v1962_v36 = vpack.c.bf16 %v208_v28, %v207_v27  ;;  %v209_v44 = vld [vmem:[#allocation5 + $0x2d0] sm:$0xff]  ;;  %v210_v45 = vld [vmem:[#allocation5 + $0x2d8] sm:$0xff] }
  0xa1   :  { %1945 = vmatpush3.bf16.msra.mxu1 %v1944_v47  ;;  %v239_v30 = vld [vmem:[#allocation5 + $0x3c0] sm:$0xff]  ;;  %v240_v31 = vld [vmem:[#allocation5 + $0x3c8] sm:$0xff]  ;;  %v442_v33 = vcombine.high %v115_v29, %v115_v29  ;;  %v241_v46 = vld [vmem:[#allocation5 + $0x3d0] sm:$0xff]  ;;  %v1966_v51 = vpack.c.bf16 %v210_v45, %v209_v44 }
  0xa2   :  { %1979 = vmatprep.subr.bf16.mxu1 %v1978_v52  ;;  %595 = vmatmul.mubr.f32.vlgmr.msra.gmra.mrb[0].mxu0 %v432_v23  ;;  %v190_v23 = vld [vmem:[#allocation5 + $0x238] sm:$0xff]  ;;  %v191_v37 = vld [vmem:[#allocation5 + $0x240] sm:$0xff]  ;;  %v192_v38 = vld [vmem:[#allocation5 + $0x248] sm:$0xff]  ;;  %v1994_v42 = vpack.c.bf16 %v240_v31, %v239_v30 }
  0xa3   :  { %1949 = vmatpush3.bf16.msra.mxu0 %v1948_v58  ;;  %v1960_v34 = vpack.c.bf16 %v190_v23, %v189_v20  ;;  %v223_v39 = vld [vmem:[#allocation5 + $0x340] sm:$0xff]  ;;  %v2589_v41 = vrot.slane %v442_v33, %v2579_v10  ;;  %v224_v43 = vld [vmem:[#allocation5 + $0x348] sm:$0xff]  ;;  %v242_v47 = vld [vmem:[#allocation5 + $0x3d8] sm:$0xff]  ;;  %v1964_v49 = vpack.c.bf16 %v192_v38, %v191_v37 }
  0xa4   :  { %665 = vmatmul.mubr.f32.vlgmr.msra.gmra.mrb[0].mxu1 %v439_v32  ;;  %1951 = vmatprep.subr.bf16.mxu0 %v1950_v60  ;;  %v2584_v32 = vrot.slane %v115_v29, %v2579_v10  ;;  %v1996_v50 = vpack.c.bf16 %v224_v43, %v223_v39  ;;  %v193_v52 = vld [vmem:[#allocation5 + $0x250] sm:$0xff]  ;;  %v194_v53 = vld [vmem:[#allocation5 + $0x258] sm:$0xff]  ;;  %v1998_v55 = vpack.c.bf16 %v242_v47, %v241_v46  ;;  %v211_v57 = vld [vmem:[#allocation5 + $0x2e0] sm:$0xff] }
  0xa5   :  { %1981 = vmatpush3.bf16.msra.mxu1 %v1980_v59  ;;  %v458_v48 = vcombine.high %v2589_v41, %v2589_v41  ;;  %v225_v54 = vld [vmem:[#allocation5 + $0x350] sm:$0xff]  ;;  %v226_v56 = vld [vmem:[#allocation5 + $0x358] sm:$0xff]  ;;  %v212_v58 = vld [vmem:[#allocation5 + $0x2e8] sm:$0xff]  ;;  %v1968_v61 = vpack.c.bf16 %v194_v53, %v193_v52 }
  0xa6   :  { %1983 = vmatprep.subr.bf16.mxu1 %v1982_v0  ;;  %v457_v40 = vcombine.high %v2584_v32, %v2584_v32  ;;  %v243_v59 = vld [vmem:[#allocation5 + $0x3e0] sm:$0xff]  ;;  %v244_v60 = vld [vmem:[#allocation5 + $0x3e8] sm:$0xff]  ;;  %v2000_v62 = vpack.c.bf16 %v226_v56, %v225_v54  ;;  %v1970_v63 = vpack.c.bf16 %v212_v58, %v211_v57  ;;  %v213_v5 = vld [vmem:[#allocation5 + $0x2f0] sm:$0xff] }
  0xa7   :  { %1953 = vmatpush3.bf16.msra.mxu0 %v1952_v6  ;;  %804 = vmatprep.mubr.f32.mxu1 %v458_v48  ;;  %v195_v0 = vld [vmem:[#allocation5 + $0x260] sm:$0xff]  ;;  %v196_v1 = vld [vmem:[#allocation5 + $0x268] sm:$0xff]  ;;  %v2002_v3 = vpack.c.bf16 %v244_v60, %v243_v59  ;;  %v214_v6 = vld [vmem:[#allocation5 + $0x2f8] sm:$0xff] }
  0xa8   :  { %1955 = vmatprep.subr.bf16.mxu0 %v1954_v8  ;;  %734 = vmatprep.mubr.f32.mxu0 %v457_v40  ;;  %v227_v2 = vld [vmem:[#allocation5 + $0x360] sm:$0xff]  ;;  %v228_v4 = vld [vmem:[#allocation5 + $0x368] sm:$0xff]  ;;  %v246_v8 = vld [vmem:[#allocation5 + $0x3f8] sm:$0xff]  ;;  %v1972_v9 = vpack.c.bf16 %v196_v1, %v195_v0  ;;  %v1974_v12 = vpack.c.bf16 %v214_v6, %v213_v5 }
  0xa9   :  { %1985 = vmatpush3.bf16.msra.mxu1 %v1984_v7  ;;  %v245_v7 = vld [vmem:[#allocation5 + $0x3f0] sm:$0xff]  ;;  %v2004_v11 = vpack.c.bf16 %v228_v4, %v227_v2  ;;  %v198_v14 = vld [vmem:[#allocation5 + $0x278] sm:$0xff]  ;;  %v263_v18 = vld [vmem:[#allocation5 + $0x480] sm:$0xff] }
  0xaa   :  { %1987 = vmatprep.subr.bf16.mxu1 %v1986_v13  ;;  %v197_v13 = vld [vmem:[#allocation5 + $0x270] sm:$0xff]  ;;  %v2006_v16 = vpack.c.bf16 %v246_v8, %v245_v7  ;;  %v230_v17 = vld [vmem:[#allocation5 + $0x378] sm:$0xff]  ;;  %v295_v20 = vld [vmem:[#allocation5 + $0x580] sm:$0xff] }
  0xab   :  { %1957 = vmatpush3.bf16.msra.mxu0 %v1956_v19  ;;  %v229_v15 = vld [vmem:[#allocation5 + $0x370] sm:$0xff]  ;;  %v264_v19 = vld [vmem:[#allocation5 + $0x488] sm:$0xff]  ;;  %v247_v23 = vld [vmem:[#allocation5 + $0x400] sm:$0xff] }
  0xac   :  { %1959 = vmatprep.subr.bf16.mxu0 %v1958_v22  ;;  %v1976_v22 = vpack.c.bf16 %v198_v14, %v197_v13  ;;  %v2008_v24 = vpack.c.bf16 %v230_v17, %v229_v15  ;;  %v2010_v25 = vpack.c.bf16 %v264_v19, %v263_v18  ;;  %v279_v27 = vld [vmem:[#allocation5 + $0x500] sm:$0xff]  ;;  %v280_v28 = vld [vmem:[#allocation5 + $0x508] sm:$0xff]  ;;  %v265_v30 = vld [vmem:[#allocation5 + $0x490] sm:$0xff] }
  0xad   :  { %1989 = vmatpush3.bf16.msra.mxu1 %v1988_v21  ;;  %v296_v21 = vld [vmem:[#allocation5 + $0x588] sm:$0xff]  ;;  %v266_v31 = vld [vmem:[#allocation5 + $0x498] sm:$0xff]  ;;  %v297_v33 = vld [vmem:[#allocation5 + $0x590] sm:$0xff] }
  0xae   :  { %1991 = vmatprep.subr.bf16.mxu1 %v1990_v26  ;;  %v248_v26 = vld [vmem:[#allocation5 + $0x408] sm:$0xff]  ;;  %v2042_v29 = vpack.c.bf16 %v296_v21, %v295_v20  ;;  %v2014_v38 = vpack.c.bf16 %v266_v31, %v265_v30  ;;  %v249_v39 = vld [vmem:[#allocation5 + $0x410] sm:$0xff]  ;;  %v250_v40 = vld [vmem:[#allocation5 + $0x418] sm:$0xff] }
  0xaf   :  { %1961 = vmatpush3.bf16.msra.mxu0 %v1960_v34  ;;  %v298_v34 = vld [vmem:[#allocation5 + $0x598] sm:$0xff]  ;;  %v116_v37 = vld [vmem:[#allocation2 + $0x10] sm:$0xff]  ;;  %v267_v47 = vld [vmem:[#allocation5 + $0x4a0] sm:$0xff]  ;;  %v2016_v53 = vpack.c.bf16 %v250_v40, %v249_v39 }
  0xb0   :  { %1963 = vmatprep.subr.bf16.mxu0 %v1962_v36  ;;  %v2044_v36 = vpack.c.bf16 %v280_v28, %v279_v27  ;;  %v2594_v43 = vrot.slane %v116_v37, %v2579_v10  ;;  %v459_v44 = vcombine.high %v116_v37, %v116_v37  ;;  %v2046_v45 = vpack.c.bf16 %v298_v34, %v297_v33  ;;  %v282_v46 = vld [vmem:[#allocation5 + $0x518] sm:$0xff]  ;;  %v268_v48 = vld [vmem:[#allocation5 + $0x4a8] sm:$0xff]  ;;  %v251_v56 = vld [vmem:[#allocation5 + $0x420] sm:$0xff] }
  0xb1   :  { %1993 = vmatpush3.bf16.msra.mxu1 %v1992_v35  ;;  %v2012_v35 = vpack.c.bf16 %v248_v26, %v247_v23  ;;  %v252_v57 = vld [vmem:[#allocation5 + $0x428] sm:$0xff]  ;;  %v283_v58 = vld [vmem:[#allocation5 + $0x520] sm:$0xff]  ;;  %v302_v0 = vld [vmem:[#allocation5 + $0x5b8] sm:$0xff] }
  0xb2   :  { %1995 = vmatprep.subr.bf16.mxu1 %v1994_v42  ;;  %v281_v42 = vld [vmem:[#allocation5 + $0x510] sm:$0xff]  ;;  %v2600_v52 = vrot.slane %v459_v44, %v2579_v10  ;;  %v284_v60 = vld [vmem:[#allocation5 + $0x528] sm:$0xff]  ;;  %v254_v4 = vld [vmem:[#allocation5 + $0x438] sm:$0xff] }
  0xb3   :  { %1965 = vmatpush3.bf16.msra.mxu0 %v1964_v49  ;;  %v299_v49 = vld [vmem:[#allocation5 + $0x5a0] sm:$0xff]  ;;  %v2048_v54 = vpack.c.bf16 %v282_v46, %v281_v42  ;;  %v2052_v1 = vpack.c.bf16 %v284_v60, %v283_v58  ;;  %v285_v5 = vld [vmem:[#allocation5 + $0x530] sm:$0xff]  ;;  %v286_v7 = vld [vmem:[#allocation5 + $0x538] sm:$0xff] }
  0xb4   :  { %1967 = vmatprep.subr.bf16.mxu0 %v1966_v51  ;;  %v474_v51 = vcombine.high %v2594_v43, %v2594_v43  ;;  %v271_v8 = vld [vmem:[#allocation5 + $0x4c0] sm:$0xff]  ;;  %v2056_v14 = vpack.c.bf16 %v286_v7, %v285_v5  ;;  %v256_v17 = vld [vmem:[#allocation5 + $0x448] sm:$0xff]  ;;  %v273_v21 = vld [vmem:[#allocation5 + $0x4d0] sm:$0xff] }
  0xb5   :  { %1997 = vmatpush3.bf16.msra.mxu1 %v1996_v50  ;;  %v300_v50 = vld [vmem:[#allocation5 + $0x5a8] sm:$0xff]  ;;  %v287_v18 = vld [vmem:[#allocation5 + $0x540] sm:$0xff]  ;;  %v305_v23 = vld [vmem:[#allocation5 + $0x5d0] sm:$0xff] }
  0xb6   :  { %1999 = vmatprep.subr.bf16.mxu1 %v1998_v55  ;;  %v2018_v55 = vpack.c.bf16 %v268_v48, %v267_v47  ;;  %v2050_v59 = vpack.c.bf16 %v300_v50, %v299_v49  ;;  %v288_v20 = vld [vmem:[#allocation5 + $0x548] sm:$0xff]  ;;  %v257_v28 = vld [vmem:[#allocation5 + $0x450] sm:$0xff]  ;;  %v290_v33 = vld [vmem:[#allocation5 + $0x558] sm:$0xff] }
  0xb7   :  { %1969 = vmatpush3.bf16.msra.mxu0 %v1968_v61  ;;  %v269_v61 = vld [vmem:[#allocation5 + $0x4b0] sm:$0xff]  ;;  %v2060_v26 = vpack.c.bf16 %v288_v20, %v287_v18  ;;  %v275_v34 = vld [vmem:[#allocation5 + $0x4e0] sm:$0xff]  ;;  %v308_v37 = vld [vmem:[#allocation5 + $0x5e8] sm:$0xff] }
  0xb8   :  { %1971 = vmatprep.subr.bf16.mxu0 %v1970_v63  ;;  %v301_v63 = vld [vmem:[#allocation5 + $0x5b0] sm:$0xff]  ;;  %v259_v42 = vld [vmem:[#allocation5 + $0x460] sm:$0xff]  ;;  %v260_v44 = vld [vmem:[#allocation5 + $0x468] sm:$0xff] }
  0xb9   :  { %2001 = vmatpush3.bf16.msra.mxu1 %v2000_v62  ;;  %v270_v62 = vld [vmem:[#allocation5 + $0x4b8] sm:$0xff]  ;;  %v2054_v6 = vpack.c.bf16 %v302_v0, %v301_v63  ;;  %v289_v30 = vld [vmem:[#allocation5 + $0x550] sm:$0xff]  ;;  %v292_v47 = vld [vmem:[#allocation5 + $0x568] sm:$0xff] }
  0xba   :  { %2003 = vmatprep.subr.bf16.mxu1 %v2002_v3  ;;  %v2022_v2 = vpack.c.bf16 %v270_v62, %v269_v61  ;;  %v253_v3 = vld [vmem:[#allocation5 + $0x430] sm:$0xff]  ;;  %v2064_v39 = vpack.c.bf16 %v290_v33, %v289_v30  ;;  %v278_v49 = vld [vmem:[#allocation5 + $0x4f8] sm:$0xff]  ;;  %v327_v61 = vld [vmem:[#allocation5 + $0x680] sm:$0xff] }
  0xbb   :  { %1973 = vmatpush3.bf16.msra.mxu0 %v1972_v9  ;;  %v272_v9 = vld [vmem:[#allocation5 + $0x4c8] sm:$0xff]  ;;  %v2024_v13 = vpack.c.bf16 %v254_v4, %v253_v3  ;;  %v277_v48 = vld [vmem:[#allocation5 + $0x4f0] sm:$0xff]  ;;  %v262_v58 = vld [vmem:[#allocation5 + $0x478] sm:$0xff] }
  0xbc   :  { %1975 = vmatprep.subr.bf16.mxu0 %v1974_v12  ;;  %v304_v12 = vld [vmem:[#allocation5 + $0x5c8] sm:$0xff]  ;;  %v2026_v15 = vpack.c.bf16 %v272_v9, %v271_v8  ;;  %v309_v50 = vld [vmem:[#allocation5 + $0x5f0] sm:$0xff]  ;;  %v294_v60 = vld [vmem:[#allocation5 + $0x578] sm:$0xff] }
  0xbd   :  { %2005 = vmatpush3.bf16.msra.mxu1 %v2004_v11  ;;  %v303_v11 = vld [vmem:[#allocation5 + $0x5c0] sm:$0xff]  ;;  %v328_v62 = vld [vmem:[#allocation5 + $0x688] sm:$0xff]  ;;  %v329_v9 = vld [vmem:[#allocation5 + $0x690] sm:$0xff] }
  0xbe   :  { %2007 = vmatprep.subr.bf16.mxu1 %v2006_v16  ;;  %v255_v16 = vld [vmem:[#allocation5 + $0x440] sm:$0xff]  ;;  %v2058_v19 = vpack.c.bf16 %v304_v12, %v303_v11  ;;  %v360_v0 = vld [vmem:[#allocation5 + $0x788] sm:$0xff]  ;;  %v2074_v3 = vpack.c.bf16 %v328_v62, %v327_v61  ;;  %v330_v11 = vld [vmem:[#allocation5 + $0x698] sm:$0xff] }
  0xbf   :  { %1977 = vmatpush3.bf16.msra.mxu0 %v1976_v22  ;;  %v274_v22 = vld [vmem:[#allocation5 + $0x4d8] sm:$0xff]  ;;  %v359_v63 = vld [vmem:[#allocation5 + $0x780] sm:$0xff]  ;;  %v312_v5 = vld [vmem:[#allocation5 + $0x608] sm:$0xff]  ;;  %v2078_v18 = vpack.c.bf16 %v330_v11, %v329_v9 }
  0xc0   :  { %2011 = vmatprep.subr.bf16.mxu0 %v2010_v25  ;;  %v2028_v25 = vpack.c.bf16 %v256_v17, %v255_v16  ;;  %v2030_v27 = vpack.c.bf16 %v274_v22, %v273_v21  ;;  %v311_v4 = vld [vmem:[#allocation5 + $0x600] sm:$0xff]  ;;  %v2106_v7 = vpack.c.bf16 %v360_v0, %v359_v63  ;;  %v344_v8 = vld [vmem:[#allocation5 + $0x708] sm:$0xff]  ;;  %v314_v20 = vld [vmem:[#allocation5 + $0x618] sm:$0xff] }
  0xc1   :  { %2009 = vmatpush3.bf16.msra.mxu1 %v2008_v24  ;;  %v306_v24 = vld [vmem:[#allocation5 + $0x5d8] sm:$0xff]  ;;  %v2076_v16 = vpack.c.bf16 %v312_v5, %v311_v4  ;;  %v345_v21 = vld [vmem:[#allocation5 + $0x710] sm:$0xff]  ;;  %v352_v62 = vld [vmem:[#allocation5 + $0x748] sm:$0xff] }
  0xc2   :  { %2043 = vmatprep.subr.bf16.mxu1 %v2042_v29  ;;  %735 = vmatmul.mubr.f32.vlgmr.msra.gmra.mrb[2].mxu0 %v2584_v32  ;;  %v475_v32 = vcombine.high %v2600_v52, %v2600_v52  ;;  %v258_v29 = vld [vmem:[#allocation5 + $0x458] sm:$0xff]  ;;  %v2062_v31 = vpack.c.bf16 %v306_v24, %v305_v23  ;;  %v331_v24 = vld [vmem:[#allocation5 + $0x6a0] sm:$0xff]  ;;  %v337_v63 = vld [vmem:[#allocation5 + $0x6d0] sm:$0xff] }
  0xc3   :  { %2013 = vmatpush3.bf16.msra.mxu0 %v2012_v35  ;;  %874 = vmatprep.mubr.f32.mxu0 %v474_v51  ;;  %v276_v35 = vld [vmem:[#allocation5 + $0x4e8] sm:$0xff]  ;;  %v310_v51 = vld [vmem:[#allocation5 + $0x5f8] sm:$0xff]  ;;  %v321_v5 = vld [vmem:[#allocation5 + $0x650] sm:$0xff] }
  0xc4   :  { %805 = vmatmul.mubr.f32.vlgmr.msra.gmra.mrb[2].mxu1 %v2589_v41  ;;  %2015 = vmatprep.subr.bf16.mxu0 %v2014_v38  ;;  %v2020_v41 = vpack.c.bf16 %v252_v57, %v251_v56  ;;  %v2032_v38 = vpack.c.bf16 %v258_v29, %v257_v28  ;;  %v2034_v40 = vpack.c.bf16 %v276_v35, %v275_v34  ;;  %v261_v57 = vld [vmem:[#allocation5 + $0x470] sm:$0xff]  ;;  %v346_v23 = vld [vmem:[#allocation5 + $0x718] sm:$0xff]  ;;  %v364_v28 = vld [vmem:[#allocation5 + $0x7a8] sm:$0xff] }
  0xc5   :  { %2045 = vmatpush3.bf16.msra.mxu1 %v2044_v36  ;;  %944 = vmatprep.mubr.f32.mxu1 %v475_v32  ;;  %v307_v36 = vld [vmem:[#allocation5 + $0x5e0] sm:$0xff]  ;;  %v2038_v56 = vpack.c.bf16 %v278_v49, %v277_v48  ;;  %v293_v32 = vld [vmem:[#allocation5 + $0x570] sm:$0xff]  ;;  %v316_v35 = vld [vmem:[#allocation5 + $0x628] sm:$0xff] }
  0xc6   :  { %2047 = vmatprep.subr.bf16.mxu1 %v2046_v45  ;;  %v291_v45 = vld [vmem:[#allocation5 + $0x560] sm:$0xff]  ;;  %v2066_v46 = vpack.c.bf16 %v308_v37, %v307_v36  ;;  %v349_v48 = vld [vmem:[#allocation5 + $0x730] sm:$0xff]  ;;  %v338_v0 = vld [vmem:[#allocation5 + $0x6d8] sm:$0xff] }
  0xc7   :  { %2017 = vmatpush3.bf16.msra.mxu0 %v2016_v53  ;;  %v2036_v53 = vpack.c.bf16 %v260_v44, %v259_v42  ;;  %v315_v34 = vld [vmem:[#allocation5 + $0x620] sm:$0xff]  ;;  %v366_v42 = vld [vmem:[#allocation5 + $0x7b8] sm:$0xff]  ;;  %v2094_v4 = vpack.c.bf16 %v338_v0, %v337_v63 }
  0xc8   :  { %2019 = vmatprep.subr.bf16.mxu0 %v2018_v55  ;;  %v2068_v55 = vpack.c.bf16 %v292_v47, %v291_v45  ;;  %v347_v36 = vld [vmem:[#allocation5 + $0x720] sm:$0xff]  ;;  %v2084_v44 = vpack.c.bf16 %v316_v35, %v315_v34  ;;  %v318_v47 = vld [vmem:[#allocation5 + $0x638] sm:$0xff]  ;;  %v357_v35 = vld [vmem:[#allocation5 + $0x770] sm:$0xff] }
  0xc9   :  { %2049 = vmatpush3.bf16.msra.mxu1 %v2048_v54  ;;  %v117_v54 = vld [vmem:[#allocation2 + $0x18] sm:$0xff]  ;;  %v339_v11 = vld [vmem:[#allocation5 + $0x6e0] sm:$0xff] }
  0xca   :  { %2051 = vmatprep.subr.bf16.mxu1 %v2050_v59  ;;  %v2070_v59 = vpack.c.bf16 %v310_v51, %v309_v50  ;;  %v2606_v12 = vrot.slane %v117_v54, %v2579_v10  ;;  %v350_v50 = vld [vmem:[#allocation5 + $0x738] sm:$0xff]  ;;  %v335_v51 = vld [vmem:[#allocation5 + $0x6c0] sm:$0xff] }
  0xcb   :  { %2021 = vmatpush3.bf16.msra.mxu0 %v2020_v41  ;;  %v476_v41 = vcombine.high %v117_v54, %v117_v54  ;;  %v367_v54 = vld [vmem:[#allocation5 + $0x7c0] sm:$0xff]  ;;  %v354_v9 = vld [vmem:[#allocation5 + $0x758] sm:$0xff] }
  0xcc   :  { %2023 = vmatprep.subr.bf16.mxu0 %v2022_v2  ;;  %v2072_v2 = vpack.c.bf16 %v294_v60, %v293_v32  ;;  %v319_v32 = vld [vmem:[#allocation5 + $0x640] sm:$0xff]  ;;  %v326_v34 = vld [vmem:[#allocation5 + $0x678] sm:$0xff] }
  0xcd   :  { %2053 = vmatpush3.bf16.msra.mxu1 %v2052_v1  ;;  %v2040_v1 = vpack.c.bf16 %v262_v58, %v261_v57  ;;  %v2120_v57 = vpack.c.bf16 %v350_v50, %v349_v48  ;;  %v351_v60 = vld [vmem:[#allocation5 + $0x740] sm:$0xff] }
  0xce   :  { %2055 = vmatprep.subr.bf16.mxu1 %v2054_v6  ;;  %v343_v6 = vld [vmem:[#allocation5 + $0x700] sm:$0xff] }
  0xcf   :  { %2025 = vmatpush3.bf16.msra.mxu0 %v2024_v13  ;;  %v361_v13 = vld [vmem:[#allocation5 + $0x790] sm:$0xff]  ;;  %v2108_v17 = vpack.c.bf16 %v344_v8, %v343_v6  ;;  %v322_v6 = vld [vmem:[#allocation5 + $0x658] sm:$0xff]  ;;  %v407_v48 = vld [vmem:[#allocation5 + $0x900] sm:$0xff] }
  0xd0   :  { %2027 = vmatprep.subr.bf16.mxu0 %v2026_v15  ;;  %v2609_v15 = vrot.slane %v476_v41, %v2579_v10  ;;  %v369_v41 = vld [vmem:[#allocation5 + $0x7d0] sm:$0xff]  ;;  %v379_v0 = vld [vmem:[#allocation5 + $0x820] sm:$0xff] }
  0xd1   :  { %2057 = vmatpush3.bf16.msra.mxu1 %v2056_v14  ;;  %v362_v14 = vld [vmem:[#allocation5 + $0x798] sm:$0xff] }
  0xd2   :  { %2059 = vmatprep.subr.bf16.mxu1 %v2058_v19  ;;  %v313_v19 = vld [vmem:[#allocation5 + $0x610] sm:$0xff]  ;;  %v2110_v22 = vpack.c.bf16 %v362_v14, %v361_v13  ;;  %v492_v29 = vcombine.high %v2609_v15, %v2609_v15  ;;  %v340_v13 = vld [vmem:[#allocation5 + $0x6e8] sm:$0xff]  ;;  %v371_v14 = vld [vmem:[#allocation5 + $0x7e0] sm:$0xff] }
  0xd3   :  { %2029 = vmatpush3.bf16.msra.mxu0 %v2028_v25  ;;  %v332_v25 = vld [vmem:[#allocation5 + $0x6a8] sm:$0xff]  ;;  %v2080_v30 = vpack.c.bf16 %v314_v20, %v313_v19  ;;  %v2098_v19 = vpack.c.bf16 %v340_v13, %v339_v11  ;;  %v323_v20 = vld [vmem:[#allocation5 + $0x660] sm:$0xff] }
  0xd4   :  { %2031 = vmatprep.subr.bf16.mxu0 %v2030_v27  ;;  %v363_v27 = vld [vmem:[#allocation5 + $0x7a0] sm:$0xff]  ;;  %v2082_v33 = vpack.c.bf16 %v332_v25, %v331_v24  ;;  %v356_v24 = vld [vmem:[#allocation5 + $0x768] sm:$0xff]  ;;  %v341_v25 = vld [vmem:[#allocation5 + $0x6f0] sm:$0xff] }
  0xd5   :  { %2061 = vmatpush3.bf16.msra.mxu1 %v2060_v26  ;;  %v491_v26 = vcombine.high %v2606_v12, %v2606_v12  ;;  %v2114_v37 = vpack.c.bf16 %v364_v28, %v363_v27  ;;  %v373_v27 = vld [vmem:[#allocation5 + $0x7f0] sm:$0xff]  ;;  %v374_v28 = vld [vmem:[#allocation5 + $0x7f8] sm:$0xff]  ;;  %v399_v13 = vld [vmem:[#allocation5 + $0x8c0] sm:$0xff] }
  0xd6   :  { %2063 = vmatprep.subr.bf16.mxu1 %v2062_v31  ;;  %v2112_v31 = vpack.c.bf16 %v346_v23, %v345_v21  ;;  %v324_v21 = vld [vmem:[#allocation5 + $0x668] sm:$0xff] }
  0xd7   :  { %2033 = vmatpush3.bf16.msra.mxu0 %v2032_v38  ;;  %v348_v38 = vld [vmem:[#allocation5 + $0x728] sm:$0xff] }
  0xd8   :  { %2035 = vmatprep.subr.bf16.mxu0 %v2034_v40  ;;  %v365_v40 = vld [vmem:[#allocation5 + $0x7b0] sm:$0xff] }
  0xd9   :  { %2065 = vmatpush3.bf16.msra.mxu1 %v2064_v39  ;;  %v334_v39 = vld [vmem:[#allocation5 + $0x6b8] sm:$0xff]  ;;  %v2118_v49 = vpack.c.bf16 %v366_v42, %v365_v40 }
  0xda   :  { %2067 = vmatprep.subr.bf16.mxu1 %v2066_v46  ;;  %v317_v46 = vld [vmem:[#allocation5 + $0x630] sm:$0xff] }
  0xdb   :  { %2037 = vmatpush3.bf16.msra.mxu0 %v2036_v53  ;;  %v336_v53 = vld [vmem:[#allocation5 + $0x6c8] sm:$0xff] }
  0xdc   :  { %2039 = vmatprep.subr.bf16.mxu0 %v2038_v56  ;;  %v2088_v56 = vpack.c.bf16 %v318_v47, %v317_v46  ;;  %v2090_v58 = vpack.c.bf16 %v336_v53, %v335_v51  ;;  %v393_v46 = vld [vmem:[#allocation5 + $0x890] sm:$0xff]  ;;  %v394_v47 = vld [vmem:[#allocation5 + $0x898] sm:$0xff] }
  0xdd   :  { %2069 = vmatpush3.bf16.msra.mxu1 %v2068_v55  ;;  %v368_v55 = vld [vmem:[#allocation5 + $0x7c8] sm:$0xff]  ;;  %v2142_v53 = vpack.c.bf16 %v394_v47, %v393_v46  ;;  %v1235_v46 = vld [vmem:[#allocation8 + $0x20] sm:$0xff]  ;;  %v1236_v47 = vld [vmem:[#allocation8 + $0x28] sm:$0xff] }
  0xde   :  { %2071 = vmatprep.subr.bf16.mxu1 %v2070_v59  ;;  %v320_v59 = vld [vmem:[#allocation5 + $0x648] sm:$0xff]  ;;  %v2122_v61 = vpack.c.bf16 %v368_v55, %v367_v54  ;;  %v377_v54 = vld [vmem:[#allocation5 + $0x810] sm:$0xff]  ;;  %v378_v55 = vld [vmem:[#allocation5 + $0x818] sm:$0xff] }
  0xdf   :  { %2041 = vmatpush3.bf16.msra.mxu0 %v2040_v1  ;;  %v370_v1 = vld [vmem:[#allocation5 + $0x7d8] sm:$0xff] }
  0xe0   :  { %2075 = vmatprep.subr.bf16.mxu0 %v2074_v3  ;;  %v2124_v3 = vpack.c.bf16 %v352_v62, %v351_v60  ;;  %v2126_v8 = vpack.c.bf16 %v370_v1, %v369_v41  ;;  %v410_v60 = vld [vmem:[#allocation5 + $0x918] sm:$0xff]  ;;  %v2144_v62 = vpack.c.bf16 %v378_v55, %v377_v54  ;;  %v380_v41 = vld [vmem:[#allocation5 + $0x828] sm:$0xff]  ;;  %v397_v1 = vld [vmem:[#allocation5 + $0x8b0] sm:$0xff] }
  0xe1   :  { %2073 = vmatpush3.bf16.msra.mxu1 %v2072_v2  ;;  %v2092_v2 = vpack.c.bf16 %v320_v59, %v319_v32  ;;  %v2442_v32 = vmov 0.0|0.0   ;;  %v409_v59 = vld [vmem:[#allocation5 + $0x910] sm:$0xff]  ;;  %v1240_v54 = vld [vmem:[#allocation8 + $0x48] sm:$0xff] }
  0xe2   :  { %2107 = vmatprep.subr.bf16.mxu1 %v2106_v7  ;;  %875 = vmatmul.mubr.f32.vlgmr.msra.gmra.mrb[4].mxu0 %v2594_v43  ;;  %v333_v43 = vld [vmem:[#allocation5 + $0x6b0] sm:$0xff] }
  0xe3   :  { %2077 = vmatpush3.bf16.msra.mxu0 %v2076_v16  ;;  %1014 = vmatprep.mubr.f32.mxu0 %v491_v26  ;;  %v2086_v45 = vpack.c.bf16 %v334_v39, %v333_v43  ;;  %v353_v7 = vld [vmem:[#allocation5 + $0x750] sm:$0xff]  ;;  %v372_v16 = vld [vmem:[#allocation5 + $0x7e8] sm:$0xff]  ;;  %v342_v26 = vld [vmem:[#allocation5 + $0x6f8] sm:$0xff] }
  0xe4   :  { %945 = vmatmul.mubr.f32.vlgmr.msra.gmra.mrb[4].mxu1 %v2600_v52  ;;  %2079 = vmatprep.subr.bf16.mxu0 %v2078_v18  ;;  %v2116_v52 = vpack.c.bf16 %v348_v38, %v347_v36  ;;  %v2128_v18 = vpack.c.bf16 %v354_v9, %v353_v7  ;;  %v2130_v23 = vpack.c.bf16 %v372_v16, %v371_v14  ;;  %v391_v38 = vld [vmem:[#allocation5 + $0x880] sm:$0xff]  ;;  %v392_v43 = vld [vmem:[#allocation5 + $0x888] sm:$0xff]  ;;  %v2617_v39 = vld [vmem:[#allocation2 + $0x20] sm:$0x3f] }
  0xe5   :  { %2109 = vmatpush3.bf16.msra.mxu1 %v2108_v17  ;;  %1084 = vmatprep.mubr.f32.mxu1 %v492_v29  ;;  %v2096_v17 = vpack.c.bf16 %v322_v6, %v321_v5  ;;  %v2100_v29 = vpack.c.bf16 %v324_v21, %v323_v20  ;;  %v2134_v36 = vpack.c.bf16 %v374_v28, %v373_v27  ;;  %v412_v5 = vld [vmem:[#allocation5 + $0x928] sm:$0xff]  ;;  %v2444_v6 = vmov 0.0   ;;  %v382_v9 = vld [vmem:[#allocation5 + $0x838] sm:$0xff]  ;;  %v401_v21 = vld [vmem:[#allocation5 + $0x8d0] sm:$0xff] }
  0xe6   :  { %2111 = vmatprep.subr.bf16.mxu1 %v2110_v22  ;;  %v355_v22 = vld [vmem:[#allocation5 + $0x760] sm:$0xff]  ;;  %v2621_v50 = vrot.slane %v2617_v39, %v2579_v10  ;;  %v400_v14 = vld [vmem:[#allocation5 + $0x8c8] sm:$0xff] }
  0xe7   :  { %2081 = vmatpush3.bf16.msra.mxu0 %v2080_v30  ;;  %v2132_v30 = vpack.c.bf16 %v356_v24, %v355_v22  ;;  %v384_v20 = vld [vmem:[#allocation5 + $0x848] sm:$0xff]  ;;  %v402_v22 = vld [vmem:[#allocation5 + $0x8d8] sm:$0xff] }
  0xe8   :  { %2083 = vmatprep.subr.bf16.mxu0 %v2082_v33  ;;  %v325_v33 = vld [vmem:[#allocation5 + $0x670] sm:$0xff]  ;;  %v2158_v24 = vpack.c.bf16 %v402_v22, %v401_v21  ;;  %v404_v27 = vld [vmem:[#allocation5 + $0x8e8] sm:$0xff] }
  0xe9   :  { %2113 = vmatpush3.bf16.msra.mxu1 %v2112_v31  ;;  %v2102_v31 = vpack.c.bf16 %v342_v26, %v341_v25  ;;  %v2104_v40 = vpack.c.bf16 %v326_v34, %v325_v33  ;;  %v385_v25 = vld [vmem:[#allocation5 + $0x850] sm:$0xff]  ;;  %v386_v26 = vld [vmem:[#allocation5 + $0x858] sm:$0xff] }
  0xea   :  { %2115 = vmatprep.subr.bf16.mxu1 %v2114_v37  ;;  %v358_v37 = vld [vmem:[#allocation5 + $0x778] sm:$0xff]  ;;  %v2160_v28 = vpack.c.bf16 %v386_v26, %v385_v25  ;;  %v405_v33 = vld [vmem:[#allocation5 + $0x8f0] sm:$0xff]  ;;  %v1335_v25 = vld [vmem:[#allocation11 + $0x50] sm:$0xff] }
  0xeb   :  { %2085 = vmatpush3.bf16.msra.mxu0 %v2084_v44  ;;  %v2136_v42 = vpack.c.bf16 %v358_v37, %v357_v35  ;;  %v2138_v44 = vpack.c.bf16 %v392_v43, %v391_v38  ;;  %v406_v34 = vld [vmem:[#allocation5 + $0x8f8] sm:$0xff]  ;;  %v389_v37 = vld [vmem:[#allocation5 + $0x870] sm:$0xff] }
  0xec   :  { %2087 = vmatprep.subr.bf16.mxu0 %v2086_v45  ;;  %v376_v45 = vld [vmem:[#allocation5 + $0x808] sm:$0xff]  ;;  %v390_v38 = vld [vmem:[#allocation5 + $0x878] sm:$0xff] }
  0xed   :  { %2117 = vmatpush3.bf16.msra.mxu1 %v2116_v52  ;;  %v375_v52 = vld [vmem:[#allocation5 + $0x800] sm:$0xff]  ;;  %v2168_v43 = vpack.c.bf16 %v390_v38, %v389_v37  ;;  %v1333_v22 = vld [vmem:[#allocation11 + $0x40] sm:$0xff]  ;;  %v1336_v26 = vld [vmem:[#allocation11 + $0x58] sm:$0xff] }
  0xee   :  { %2119 = vmatprep.subr.bf16.mxu1 %v2118_v49  ;;  %v408_v49 = vld [vmem:[#allocation5 + $0x908] sm:$0xff]  ;;  %v2140_v51 = vpack.c.bf16 %v376_v45, %v375_v52 }
  0xef   :  { %2089 = vmatpush3.bf16.msra.mxu0 %v2088_v56  ;;  %v395_v56 = vld [vmem:[#allocation5 + $0x8a0] sm:$0xff]  ;;  %v1234_v52 = vld [vmem:[#allocation8 + $0x18] sm:$0xff] }
  0xf0   :  { %2091 = vmatprep.subr.bf16.mxu0 %v2090_v58  ;;  %v396_v58 = vld [vmem:[#allocation5 + $0x8a8] sm:$0xff] }
  0xf1   :  { %2121 = vmatpush3.bf16.msra.mxu1 %v2120_v57  ;;  %v2171_v57 = vpack.c.bf16 %v408_v49, %v407_v48  ;;  %v2146_v63 = vpack.c.bf16 %v396_v58, %v395_v56  ;;  %v2186_v48 = vpack.c.bf16 %v1236_v47, %v1235_v46  ;;  %v1237_v49 = vld [vmem:[#allocation8 + $0x30] sm:$0xff] }
  0xf2   :  { %2123 = vmatprep.subr.bf16.mxu1 %v2122_v61  ;;  %v508_v61 = vcombine.high %v2621_v50, %v2621_v50  ;;  %v1241_v56 = vld [vmem:[#allocation8 + $0x50] sm:$0xff] }
  0xf3   :  { %2093 = vmatpush3.bf16.msra.mxu0 %v2092_v2  ;;  %v2174_v2 = vpack.c.bf16 %v410_v60, %v409_v59  ;;  %v1243_v60 = vld [vmem:[#allocation8 + $0x60] sm:$0xff] }
  0xf4   :  { %2095 = vmatprep.subr.bf16.mxu0 %v2094_v4  ;;  %v411_v4 = vld [vmem:[#allocation5 + $0x920] sm:$0xff] }
  0xf5   :  { %2125 = vmatpush3.bf16.msra.mxu1 %v2124_v3  ;;  %v398_v3 = vld [vmem:[#allocation5 + $0x8b8] sm:$0xff]  ;;  %v2177_v11 = vpack.c.bf16 %v412_v5, %v411_v4  ;;  %v1245_v5 = vld [vmem:[#allocation8 + $0x70] sm:$0xff] }
  0xf6   :  { %2127 = vmatprep.subr.bf16.mxu1 %v2126_v8  ;;  %v2150_v7 = vpack.c.bf16 %v398_v3, %v397_v1  ;;  %v381_v8 = vld [vmem:[#allocation5 + $0x830] sm:$0xff] }
  0xf7   :  { %2097 = vmatpush3.bf16.msra.mxu0 %v2096_v17  ;;  %v2152_v16 = vpack.c.bf16 %v382_v9, %v381_v8  ;;  %v1326_v8 = vld [vmem:[#allocation11 + $0x8] sm:$0xff]  ;;  %v1327_v9 = vld [vmem:[#allocation11 + $0x10] sm:$0xff] }
  0xf8   :  { %2099 = vmatprep.subr.bf16.mxu0 %v2098_v19  ;;  %v383_v19 = vld [vmem:[#allocation5 + $0x840] sm:$0xff] }
  0xf9   :  { %2129 = vmatpush3.bf16.msra.mxu1 %v2128_v18  ;;  %v2154_v18 = vpack.c.bf16 %v400_v14, %v399_v13  ;;  %v1328_v13 = vld [vmem:[#allocation11 + $0x18] sm:$0xff] }
  0xfa   :  { %2131 = vmatprep.subr.bf16.mxu1 %v2130_v23  ;;  %v2156_v23 = vpack.c.bf16 %v384_v20, %v383_v19  ;;  %v2207_v14 = vpack.c.bf16 %v1328_v13, %v1327_v9  ;;  %v1331_v19 = vld [vmem:[#allocation11 + $0x30] sm:$0xff]  ;;  %v1332_v20 = vld [vmem:[#allocation11 + $0x38] sm:$0xff] }
  0xfb   :  { %2101 = vmatpush3.bf16.msra.mxu0 %v2100_v29  ;;  %v2213_v21 = vpack.c.bf16 %v1332_v20, %v1331_v19 }
  0xfc   :  { %2103 = vmatprep.subr.bf16.mxu0 %v2102_v31  ;;  %v388_v31 = vld [vmem:[#allocation5 + $0x868] sm:$0xff] }
  0xfd   :  { %2133 = vmatpush3.bf16.msra.mxu1 %v2132_v30  ;;  %v387_v30 = vld [vmem:[#allocation5 + $0x860] sm:$0xff] }
  0xfe   :  { %2135 = vmatprep.subr.bf16.mxu1 %v2134_v36  ;;  %v2164_v35 = vpack.c.bf16 %v388_v31, %v387_v30  ;;  %v2166_v36 = vpack.c.bf16 %v406_v34, %v405_v33 }
  0xff   :  { %2105 = vmatpush3.bf16.msra.mxu0 %v2104_v40  ;;  %v1232_v40 = vld [vmem:[#allocation8 + $0x8] sm:$0xff] }
 0x100   :  { %2139 = vmatprep.subr.bf16.mxu0 %v2138_v44 }
 0x101   :  { %2137 = vmatpush3.bf16.msra.mxu1 %v2136_v42  ;;  %v1233_v42 = vld [vmem:[#allocation8 + $0x10] sm:$0xff] }
 0x102   :  { %2170 = vmatprep.subr.bf16.mxu1 %v2442_v32  ;;  %1015 = vmatmul.mubr.f32.vlgmr.msra.gmra.mrb[6].mxu0 %v2606_v12  ;;  %v2148_v12 = vpack.c.bf16 %v380_v41, %v379_v0  ;;  %v2183_v45 = vpack.c.bf16 %v1234_v52, %v1233_v42 }
 0x103   :  { %2141 = vmatpush3.bf16.msra.mxu0 %v2140_v51  ;;  %1154 = vmatprep.mubr.f32.mxu0 %v508_v61  ;;  %v1238_v51 = vld [vmem:[#allocation8 + $0x38] sm:$0xff]  ;;  %v1244_v61 = vld [vmem:[#allocation8 + $0x68] sm:$0xff] }
 0x104   :  { %1085 = vmatmul.mubr.f32.vlgmr.msra.gmra.mrb[6].mxu1 %v2609_v15  ;;  %2143 = vmatprep.subr.bf16.mxu0 %v2142_v53  ;;  %v493_v15 = vcombine.high %v2617_v39, %v2617_v39  ;;  %v1231_v39 = vld [vmem:[#allocation8] sm:$0xff]  ;;  %v2198_v41 = vpack.c.bf16 %v1244_v61, %v1243_v60 }
 0x105   :  { %2172 = vmatpush3.bf16.msra.mxu1 %v2171_v57  ;;  %1809 = vmatprep.mubr.msk.f32.mxu1 %vm2443_vm0, %v2444_v6  ;;  %v2180_v44 = vpack.c.bf16 %v1232_v40, %v1231_v39  ;;  %v1239_v53 = vld [vmem:[#allocation8 + $0x40] sm:$0xff]  ;;  %v1242_v57 = vld [vmem:[#allocation8 + $0x58] sm:$0xff] }
 0x106   :  { %2173 = vmatprep.subr.bf16.mxu1 %v2442_v32  ;;  %v507_v17 = vrot.slane %v493_v15, %v2579_v10  ;;  %v403_v10 = vld [vmem:[#allocation5 + $0x8e0] sm:$0xff]  ;;  %v2192_v55 = vpack.c.bf16 %v1240_v54, %v1239_v53  ;;  %v2195_v58 = vpack.c.bf16 %v1242_v57, %v1241_v56 }
 0x107   :  { %2145 = vmatpush3.bf16.msra.mxu0 %v2144_v62  ;;  %v2162_v29 = vpack.c.bf16 %v404_v27, %v403_v10  ;;  %v1437_v62 = vld [vmem:[#allocation7] ss:$0 sm:$0xff]  ;;  %v2219_v10 = vpack.c.bf16 %v1336_v26, %v1335_v25  ;;  %v1337_v27 = vld [vmem:[#allocation11 + $0x60] sm:$0xff] }
 0x108   :  { %2147 = vmatprep.subr.bf16.mxu0 %v2146_v63 }
 0x109   :  { %2175 = vmatpush3.bf16.msra.mxu1 %v2174_v2 }
 0x10a   :  { %2176 = vmatprep.subr.bf16.mxu1 %v2442_v32 }
 0x10b   :  { %2149 = vmatpush3.bf16.msra.mxu0 %v2148_v12 }
 0x10c   :  { %2151 = vmatprep.subr.bf16.mxu0 %v2150_v7  ;;  %v1325_v7 = vld [vmem:[#allocation11] sm:$0xff] }
 0x10d   :  { %2178 = vmatpush3.bf16.msra.mxu1 %v2177_v11  ;;  %v2204_v11 = vpack.c.bf16 %v1326_v8, %v1325_v7 }
 0x10e   :  { %2179 = vmatprep.subr.bf16.mxu1 %v2442_v32 }
 0x10f   :  { %2153 = vmatpush3.bf16.msra.mxu0 %v2152_v16  ;;  %v1329_v16 = vld [vmem:[#allocation11 + $0x20] sm:$0xff] }
 0x110   :  { %1810 = vmatmul.mubr.msk.f32.vlgmr.msra.gmra.mrb[8].mxu1 %vm527_vm1, %v507_v17  ;;  %2155 = vmatprep.subr.bf16.mxu0 %v2154_v18  ;;  %v1330_v17 = vld [vmem:[#allocation11 + $0x28] sm:$0xff] }
 0x111   :  { %1844 = vmatprep.mubr.msk.f32.mxu1 %vm2443_vm0, %v2444_v6  ;;  %2181 = vmatpush3.bf16.msra.mxu1 %v2180_v44  ;;  %v2210_v18 = vpack.c.bf16 %v1330_v17, %v1329_v16 }
 0x112   :  { %2182 = vmatprep.subr.bf16.mxu1 %v2442_v32 }
 0x113   :  { %2157 = vmatpush3.bf16.msra.mxu0 %v2156_v23  ;;  %v1334_v23 = vld [vmem:[#allocation11 + $0x48] sm:$0xff] }
 0x114   :  { %2159 = vmatprep.subr.bf16.mxu0 %v2158_v24  ;;  %v2216_v24 = vpack.c.bf16 %v1334_v23, %v1333_v22 }
 0x115   :  { %2184 = vmatpush3.bf16.msra.mxu1 %v2183_v45 }
 0x116   :  { %2185 = vmatprep.subr.bf16.mxu1 %v2442_v32 }
 0x117   :  { %2161 = vmatpush3.bf16.msra.mxu0 %v2160_v28  ;;  %v1338_v28 = vld [vmem:[#allocation11 + $0x68] sm:$0xff] }
 0x118   :  { %2163 = vmatprep.subr.bf16.mxu0 %v2162_v29  ;;  %v2222_v33 = vpack.c.bf16 %v1338_v28, %v1337_v27 }
 0x119   :  { %2187 = vmatpush3.bf16.msra.mxu1 %v2186_v48 }
 0x11a   :  { %2188 = vmatprep.subr.bf16.mxu1 %v2442_v32 }
 0x11b   :  { %2165 = vmatpush3.bf16.msra.mxu0 %v2164_v35 }
 0x11c   :  { %2167 = vmatprep.subr.bf16.mxu0 %v2166_v36 }
 0x11f   :  { %2169 = vmatpush3.bf16.msra.mxu0 %v2168_v43 }
 0x120   :  { %2203 = vmatprep.subr.bf16.mxu0 %v2442_v32 }
 0x122   :  { %1155 = vmatmul.mubr.f32.vlgmr.msra.gmra.mrb[8].mxu0 %v2621_v50  ;;  %v2189_v50 = vpack.c.bf16 %v1238_v51, %v1237_v49 }
 0x123   :  { %1879 = vmatprep.mubr.msk.f32.mxu0 %vm2443_vm0, %v2444_v6  ;;  %v1246_v6 = vld [vmem:[#allocation8 + $0x78] sm:$0xff]  ;;  %2205 = vmatpush3.bf16.msra.mxu0 %v2204_v11 }
 0x124   :  { %2190 = vmatpush3.bf16.msra.mxu1 %v2189_v50  ;;  %v2201_v12 = vpack.c.bf16 %v1246_v6, %v1245_v5  ;;  %2206 = vmatprep.subr.bf16.mxu0 %v2442_v32  ;;  %v1440_v6 = vld [vmem:[#allocation13] ss:$0 sm:$0xff] }
 0x125   :  { %2191 = vmatprep.subr.bf16.mxu1 %v2442_v32 }
 0x127   :  { %2208 = vmatpush3.bf16.msra.mxu0 %v2207_v14 }
 0x128   :  { %2193 = vmatpush3.bf16.msra.mxu1 %v2192_v55  ;;  %2209 = vmatprep.subr.bf16.mxu0 %v2442_v32 }
 0x129   :  { %2194 = vmatprep.subr.bf16.mxu1 %v2442_v32 }
 0x12b   :  { %2211 = vmatpush3.bf16.msra.mxu0 %v2210_v18 }
 0x12c   :  { %2196 = vmatpush3.bf16.msra.mxu1 %v2195_v58  ;;  %2212 = vmatprep.subr.bf16.mxu0 %v2442_v32 }
 0x12d   :  { %2197 = vmatprep.subr.bf16.mxu1 %v2442_v32 }
 0x12f   :  { %2214 = vmatpush3.bf16.msra.mxu0 %v2213_v21 }
 0x130   :  { %2199 = vmatpush3.bf16.msra.mxu1 %v2198_v41  ;;  %2215 = vmatprep.subr.bf16.mxu0 %v2442_v32 }
 0x131   :  { %2200 = vmatprep.subr.bf16.mxu1 %v2442_v32 }
 0x133   :  { %2217 = vmatpush3.bf16.msra.mxu0 %v2216_v24 }
 0x134   :  { %2202 = vmatpush3.bf16.msra.mxu1 %v2201_v12  ;;  %2218 = vmatprep.subr.bf16.mxu0 %v2442_v32 }
 0x137   :  { %2220 = vmatpush3.bf16.msra.mxu0 %v2219_v10 }
 0x138   :  { %2221 = vmatprep.subr.bf16.mxu0 %v2442_v32 }
 0x13b   :  { %2223 = vmatpush3.bf16.msra.mxu0 %v2222_v33 }
 0x13c   :  { %2224 = vmatprep.subr.bf16.mxu0 %v2442_v32 }
 0x175   :  { %v1473_v59 = vpop.f32.mrb[0].mxu0 }
 0x176   :  { %v1474_v63 = vpop.f32.mrb[1].mxu0 }
 0x177   :  { %v1508_v0 = vpop.f32.mrb[0].mxu1  ;;  %v1475_v1 = vadd.f32 %v1474_v63, %v1473_v59  ;;  %v1339_v63 = vld [vmem:[#allocation11 + $0x70] sm:$0xff] }
 0x178   :  { %v1509_v2 = vpop.f32.mrb[1].mxu1 }
 0x179   :  { %v1510_v3 = vadd.f32 %v1509_v2, %v1508_v0  ;;  %v597_v4 = vadd.f32 %v1475_v1, %v1437_v62  ;;  %v1340_v0 = vld [vmem:[#allocation11 + $0x78] sm:$0xff] }
 0x17a   :  { %v2225_v41 = vpack.c.bf16 %v1340_v0, %v1339_v63  ;;  %v1439_v1 = vld [vmem:[#allocation10] ss:$0 sm:$0xff] }
 0x17b   :  { %v667_v15 = vadd.f32 %v1510_v3, %v597_v4 }
 0x17c   :  { %2226 = vmatpush3.bf16.msra.mxu0 %v2225_v41 }
 0x195   :  { %v1543_v29 = vpop.f32.mrb[2].mxu0 }
 0x196   :  { %v1544_v30 = vpop.f32.mrb[3].mxu0 }
 0x197   :  { %v1578_v31 = vpop.f32.mrb[2].mxu1  ;;  %v1545_v34 = vadd.f32 %v1544_v30, %v1543_v29 }
 0x198   :  { %v1579_v35 = vpop.f32.mrb[3].mxu1 }
 0x199   :  { %v1580_v36 = vadd.f32 %v1579_v35, %v1578_v31  ;;  %v737_v37 = vadd.f32 %v1545_v34, %v667_v15 }
 0x19b   :  { %v807_v38 = vadd.f32 %v1580_v36, %v737_v37 }
 0x1b5   :  { %v1613_v43 = vpop.f32.mrb[4].mxu0 }
 0x1b6   :  { %v1614_v39 = vpop.f32.mrb[5].mxu0 }
 0x1b7   :  { %v1648_v40 = vpop.f32.mrb[4].mxu1  ;;  %v1615_v42 = vadd.f32 %v1614_v39, %v1613_v43 }
 0x1b8   :  { %v1649_v44 = vpop.f32.mrb[5].mxu1 }
 0x1b9   :  { %v1650_v52 = vadd.f32 %v1649_v44, %v1648_v40  ;;  %v877_v45 = vadd.f32 %v1615_v42, %v807_v38 }
 0x1bb   :  { %v947_v46 = vadd.f32 %v1650_v52, %v877_v45 }
 0x1d5   :  { %v1683_v47 = vpop.f32.mrb[6].mxu0 }
 0x1d6   :  { %v1684_v48 = vpop.f32.mrb[7].mxu0 }
 0x1d7   :  { %v1718_v49 = vpop.f32.mrb[6].mxu1  ;;  %v1685_v51 = vadd.f32 %v1684_v48, %v1683_v47 }
 0x1d8   :  { %v1719_v50 = vpop.f32.mrb[7].mxu1 }
 0x1d9   :  { %v1720_v53 = vadd.f32 %v1719_v50, %v1718_v49  ;;  %v1017_v54 = vadd.f32 %v1685_v51, %v947_v46 }
 0x1db   :  { %v1087_v55 = vadd.f32 %v1720_v53, %v1017_v54 }
 0x1e3   :  { %v1226_v56 = vpop.f32.mrb[8].mxu1 }
 0x1e4   :  { %v1811_v57 = vpop.f32.mrb[9].mxu1 }
 0x1f5   :  { %v1753_v58 = vpop.f32.mrb[8].mxu0 }
 0x1f6   :  { %v1754_v32 = vpop.f32.mrb[9].mxu0 }
 0x1f7   :  { %v1755_v59 = vadd.f32 %v1754_v32, %v1753_v58 }
 0x1f9   :  { %v1157_v60 = vadd.f32 %v1755_v59, %v1087_v55 }
 0x1fb   :  { %v1227_v61 = vadd.f32 %v1226_v56, %v1157_v60 }
 0x1fd   :  { %v1230_v62 = vmax.f32 %v1227_v61, 0.0 }
 0x1ff   :  { %1845 = vmatmul.mubr.f32.vlgmr.msra.gmra.mrb[10].mxu1 %v1230_v62 }
 0x2d2   :  { %v1320_v2 = vpop.f32.mrb[10].mxu1 }
 0x2d3   :  { %v1321_v3 = vadd.f32 %v1439_v1, %v1320_v2  ;;  %v1846_v4 = vpop.f32.mrb[11].mxu1 }
 0x2d5   :  { %v1324_v5 = vmax.f32 %v1321_v3, 0.0 }
 0x2d7   :  { %1880 = vmatmul.mubr.f32.vlgmr.msra.gmra.mrb[10].mxu0 %v1324_v5 }
 0x3aa   :  { %v1414_v12 = vpop.f32.mrb[10].mxu0 }
 0x3ab   :  { %v1415_v15 = vadd.f32 %v1440_v6, %v1414_v12  ;;  %v1881_v7 = vpop.f32.mrb[11].mxu0 }
 0x3ad   :  { %1418 = vst [vmem:[#allocation14] sm:$0x3] %v1415_v15 }
 0x3ae   :  { %2411 = shalt.err (!%p2408_p4)
}
 0x3af   :  { %s2412_s15 = scalar_lea.hbm %s2672_s7, 32 }
 0x3b0   :  { %p2413_p5 = scmp.ne.s32.totalorder %s2672_s7, %s2412_s15  ;;  %p2416_p6 = scmp.lt.u32.totalorder %s2412_s15, %s2672_s7 }
 0x3b2   :  { %p2418_p7 = pnand %p2416_p6, %p2413_p5 }
 0x3b4   :  { %2421 = shalt.err (!%p2418_p7)
}
 0x3b5   :  { %1428 = dma.vmem_to_hbm [thread:$0]  %s1426_s13, 32, %s2672_s7, [#allocation4]  }
 0x3b6   :  { %2430 = dma.done.wait [#allocation4], 32  }
 0x3b7   :  { %2431 = vsyncadd [#allocation4], 4294967264 }
 0x3b8   :  { %1432 = vsyncpa [#allocation3], 1 }
 0x3b9   :  { %1433 = vsyncpa [#allocation6], 1 }
 0x3ba   :  { %1434 = vsyncpa [#allocation9], 1 }
 0x3bb   :  { %1435 = vsyncpa [#allocation12], 1 }
 0x3bc   :  { %1436 = vsyncpa [#allocation4], 1 }

</bundles_post_ra>
